<compile_context>
chip_gen: v5e
topology: v5e:2x2
jax: 0.10.0
libtpu: 0.0.40
codegen_flags: <defaults>
</compile_context>

<pallas_src>
import math

import jax
import jax.numpy as jnp
from jax import lax
from jax.experimental import pallas as pl
from jax.experimental.pallas import tpu as pltpu

BATCH_TILE = 16  # sublane tile: multiple of 8 (f32 state) and 16 (bf16 xg0)


# -----------------------------------------------------------------------------
# Pallas kernel: LSTM recurrence (all layers, all timesteps), register state.
# -----------------------------------------------------------------------------
def lstm_encoder_kernel(xg0_ref, len_ref, whh0_ref, wih_up_ref, whh_up_ref,
                        bup_ref, out_ref):
    # xg0_ref   : (T, BT, 4H) bf16  precomputed layer-0 input gates (x@Wih0^T + b0)
    # len_ref   : (BT, 1)     i32   valid lengths per batch row
    # whh0_ref  : (H, 4H)     bf16  layer-0 hidden->gates weights (pre-transposed)
    # wih_up_ref: (L-1, H, 4H) bf16 input->gates weights, layers >= 1
    # whh_up_ref: (L-1, H, 4H) bf16 hidden->gates weights, layers >= 1
    # bup_ref   : (L-1, 1, 4H) f32  combined biases, layers >= 1
    # out_ref   : (BT, 2*L*H) f32   lane-dense slab [h_0 .. h_{L-1} | c_0 .. c_{L-1}]
    T, B, G = xg0_ref.shape
    H = G // 4
    L = out_ref.shape[1] // (2 * H)

    # ---- hoisted invariants: read / broadcast once, outside the time loop ----
    lengths = len_ref[...]                                        # (B, 1) i32
    whh0 = whh0_ref[...]                                          # (H, 4H) bf16
    wih_up = [wih_up_ref[l] for l in range(L - 1)]                # (H, 4H) bf16
    whh_up = [whh_up_ref[l] for l in range(L - 1)]                # (H, 4H) bf16
    bups = [jnp.broadcast_to(bup_ref[l], (B, G)) for l in range(L - 1)]

    lane = lax.broadcasted_iota(jnp.int32, (B, G), 1)
    is_tanh = lane >= 3 * H                       # gate order [i, f, o, g]
    gmul = jnp.where(is_tanh, 1.0, 0.5)           # tanh lanes: x ; sigmoid lanes: x/2
    gadd = jnp.where(is_tanh, 0.0, 0.5)           # sigmoid(x) = 0.5*tanh(x/2) + 0.5

    # One (B, H) mask per timestep, hoisted and shared by all layers.
    masks = [jnp.broadcast_to(lengths > t, (B, H)) for t in range(T)]

    # ---- state carried in registers; out_ref written once at the end ----
    h = [jnp.zeros((B, H), jnp.float32) for _ in range(L)]
    c = [jnp.zeros((B, H), jnp.float32) for _ in range(L)]

    def lstm_cell(gates, h_prev, c_prev, mask):
        # Single full-width EUP pass for all four gates.
        y = jnp.tanh(gates * gmul)
        act = y * gmul + gadd
        i_g = act[:, 0 * H:1 * H]
        f_g = act[:, 1 * H:2 * H]
        o_g = act[:, 2 * H:3 * H]
        g_g = act[:, 3 * H:4 * H]
        c_new = f_g * c_prev + i_g * g_g
        h_new = o_g * jnp.tanh(c_new)
        # pack_padded_sequence semantics: freeze state past the valid length.
        return jnp.where(mask, h_new, h_prev), jnp.where(mask, c_new, c_prev)

    # Wavefront schedule: wall step s runs layer l on timestep t = s - l.
    # Layers are visited in decreasing order so layer l reads layer l-1's
    # output from the PREVIOUS wall step (i.e. timestep t), which makes the
    # cells within one wall step data-independent (their MXU/EUP work overlaps).
    # TODO(synk): for large T switch to lax.fori_loop (modest unroll) and a
    # T-tiled BlockSpec for xg0 (plus vmem_limit_bytes) so VMEM stays bounded.
    for s in range(T + L - 1):
        for l in range(L - 1, -1, -1):
            t = s - l
            if t < 0 or t >= T:
                continue
            if l == 0:
                gates = xg0_ref[t].astype(jnp.float32) + jnp.dot(
                    h[0].astype(jnp.bfloat16), whh0,
                    preferred_element_type=jnp.float32)
            else:
                # Two pipelined MXU dots instead of a lane-axis concat + one dot.
                gates = (jnp.dot(h[l - 1].astype(jnp.bfloat16), wih_up[l - 1],
                                 preferred_element_type=jnp.float32)
                         + jnp.dot(h[l].astype(jnp.bfloat16), whh_up[l - 1],
                                   preferred_element_type=jnp.float32)
                         + bups[l - 1])
            h[l], c[l] = lstm_cell(gates, h[l], c[l], masks[t])

    # Lane-dense final store: one unmasked (BT, 2*L*H) write.
    out_ref[...] = jnp.concatenate(h + c, axis=1)


# -----------------------------------------------------------------------------
# Wrapper: token->gates table gather + pallas_call with batch-parallel grid.
# -----------------------------------------------------------------------------
def encoder_forward(src, lengths, params):
    B, T = src.shape
    L = params["num_layers"]
    H = params["whh0"].shape[0]
    G = 4 * H

    # Pad batch to a multiple of the 16-row tile (covers the f32 8-sublane and
    # bf16 16-sublane packing): unmasked VMEM blocks / MXU rows. Padded rows get
    # length 0 so their state stays zero; sliced off below.
    B_pad = -(-B // BATCH_TILE) * BATCH_TILE
    pad_b = B_pad - B
    src_p = jnp.pad(src, ((0, pad_b), (0, 0)),
                    constant_values=params["padding_idx"])
    len_p = jnp.concatenate(
        [lengths.astype(jnp.int32), jnp.zeros((pad_b,), jnp.int32)])

    # Hoisted layer-0 input projection as a token -> gates table:
    #   xg_table[v] = emb[v] @ Wih0^T + (b_ih0 + b_hh0)
    # Gathered directly in (T, B, 4H) order (no wrapper-side big matmul or
    # transpose). nn.Dropout is identity in eval mode.
    xg_table = params["embedding"] @ params["wih0"] + params["b0"]   # (V, 4H) f32
    xg0 = xg_table[src_p.T].astype(jnp.bfloat16)                     # (T, B_pad, 4H)

    nb = B_pad // BATCH_TILE
    Lm1 = max(L - 1, 1)
    out = pl.pallas_call(
        lstm_encoder_kernel,
        out_shape=jax.ShapeDtypeStruct((B_pad, 2 * L * H), jnp.float32),
        grid_spec=pltpu.PrefetchScalarGridSpec(
            num_scalar_prefetch=0,
            grid=(nb,),
            in_specs=[
                pl.BlockSpec((T, BATCH_TILE, G), lambda b: (0, b, 0)),
                pl.BlockSpec((BATCH_TILE, 1), lambda b: (b, 0)),
                pl.BlockSpec((H, G), lambda b: (0, 0)),
                pl.BlockSpec((Lm1, H, G), lambda b: (0, 0, 0)),
                pl.BlockSpec((Lm1, H, G), lambda b: (0, 0, 0)),
                pl.BlockSpec((Lm1, 1, G), lambda b: (0, 0, 0)),
            ],
            out_specs=pl.BlockSpec((BATCH_TILE, 2 * L * H), lambda b: (b, 0)),
        ),
        # Recurrence is independent per batch row: a parallel batch axis uses
        # both TensorCores on v7x once the real batch spans multiple tiles.
        compiler_params=pltpu.CompilerParams(
            dimension_semantics=("parallel",)),
    )(xg0, len_p.reshape(B_pad, 1), params["whh0"], params["wih_up"],
      params["whh_up"], params["bup"])

    hidden = out[:B, :L * H].reshape(B, L, H).transpose(1, 0, 2)
    cell = out[:B, L * H:].reshape(B, L, H).transpose(1, 0, 2)
    return hidden, cell


# -----------------------------------------------------------------------------
# Parameter construction (PyTorch-style shapes & init) + kernel weight packing.
# -----------------------------------------------------------------------------
def _reorder_ifgo_to_ifog(w):
    # Last-dim columns in PyTorch gate order [i|f|g|o] -> kernel order [i|f|o|g].
    G = w.shape[-1]
    H = G // 4
    return jnp.concatenate(
        [w[..., :2 * H], w[..., 3 * H:], w[..., 2 * H:3 * H]], axis=-1)


def make_params(key, input_dim, emb_dim, hidden_dim, num_layers, padding_idx):
    keys = jax.random.split(key, 1 + 4 * num_layers)
    emb = 0.1 * jax.random.normal(keys[0], (input_dim, emb_dim), jnp.float32)
    emb = emb.at[padding_idx].set(0.0)

    H = hidden_dim
    bound = 1.0 / math.sqrt(hidden_dim)
    w_ih_raw, w_hh_raw, b_ih_raw, b_hh_raw = [], [], [], []
    for l in range(num_layers):
        k0, k1, k2, k3 = keys[1 + 4 * l:1 + 4 * (l + 1)]
        in_dim = emb_dim if l == 0 else hidden_dim
        w_ih_raw.append(jax.random.uniform(k0, (4 * H, in_dim), jnp.float32, -bound, bound))
        w_hh_raw.append(jax.random.uniform(k1, (4 * H, H), jnp.float32, -bound, bound))
        b_ih_raw.append(jax.random.uniform(k2, (4 * H,), jnp.float32, -bound, bound))
        b_hh_raw.append(jax.random.uniform(k3, (4 * H,), jnp.float32, -bound, bound))

    # Kernel packing: transposed weights, gate columns reordered
    # [i,f,g,o] -> [i,f,o,g], recurrent weights stored bf16 (f32 accumulate in
    # the kernel), biases kept f32.
    wih0 = _reorder_ifgo_to_ifog(w_ih_raw[0].T)                             # (E, 4H) f32
    whh0 = _reorder_ifgo_to_ifog(w_hh_raw[0].T).astype(jnp.bfloat16)        # (H, 4H)
    b0 = _reorder_ifgo_to_ifog((b_ih_raw[0] + b_hh_raw[0]).reshape(1, -1))  # (1, 4H) f32
    if num_layers > 1:
        wih_up = jnp.stack([_reorder_ifgo_to_ifog(w_ih_raw[l].T)
                            for l in range(1, num_layers)]).astype(jnp.bfloat16)
        whh_up = jnp.stack([_reorder_ifgo_to_ifog(w_hh_raw[l].T)
                            for l in range(1, num_layers)]).astype(jnp.bfloat16)
        bup = jnp.stack([_reorder_ifgo_to_ifog((b_ih_raw[l] + b_hh_raw[l]).reshape(1, -1))
                         for l in range(1, num_layers)])                    # (L-1, 1, 4H)
    else:  # dummy (never read) so pallas_call never sees a zero-size array
        wih_up = jnp.zeros((1, H, 4 * H), jnp.bfloat16)
        whh_up = jnp.zeros((1, H, 4 * H), jnp.bfloat16)
        bup = jnp.zeros((1, 1, 4 * H), jnp.float32)

    return {
        "embedding": emb,
        "padding_idx": padding_idx,
        "num_layers": num_layers,
        # raw PyTorch-layout weights (used only by the pure-JAX reference)
        "w_ih_raw": w_ih_raw, "w_hh_raw": w_hh_raw,
        "b_ih_raw": b_ih_raw, "b_hh_raw": b_hh_raw,
        # packed weights consumed by the kernel / wrapper
        "wih0": wih0, "whh0": whh0, "b0": b0,
        "wih_up": wih_up, "whh_up": whh_up, "bup": bup,
    }


# -----------------------------------------------------------------------------
# Pure-JAX reference (mirrors PyTorch Embedding + LSTM + packed-seq final state).
# -----------------------------------------------------------------------------
def reference_forward(src, lengths, params):
    emb = params["embedding"][src].astype(jnp.float32)       # (B, T, E)
    B, T, _ = emb.shape
    L = params["num_layers"]
    H = params["w_hh_raw"][0].shape[1]
    h = jnp.zeros((L, B, H), jnp.float32)
    c = jnp.zeros((L, B, H), jnp.float32)
    for t in range(T):
        mask = (lengths > t).reshape(B, 1)
        x = emb[:, t, :]
        for l in range(L):
            gates = (x @ params["w_ih_raw"][l].T + h[l] @ params["w_hh_raw"][l].T
                     + params["b_ih_raw"][l] + params["b_hh_raw"][l])
            i_g = jax.nn.sigmoid(gates[:, 0 * H:1 * H])
            f_g = jax.nn.sigmoid(gates[:, 1 * H:2 * H])
            g_g = jnp.tanh(gates[:, 2 * H:3 * H])
            o_g = jax.nn.sigmoid(gates[:, 3 * H:4 * H])
            c_new = f_g * c[l] + i_g * g_g
            h_new = o_g * jnp.tanh(c_new)
            h = h.at[l].set(jnp.where(mask, h_new, h[l]))
            c = c.at[l].set(jnp.where(mask, c_new, c[l]))
            x = h[l]
    return h, c


if __name__ == "__main__":
    # Module hyperparameters (small).
    INPUT_DIM = 50      # vocab size
    EMB_DIM = 32
    HIDDEN_DIM = 32
    NUM_LAYERS = 2
    PADDING_IDX = 0
    B, T = 2, 8

    key = jax.random.PRNGKey(0)
    k_par, k_src = jax.random.split(key)
    params = make_params(k_par, INPUT_DIM, EMB_DIM, HIDDEN_DIM, NUM_LAYERS, PADDING_IDX)

    # src: (B, T) token ids; positions >= length hold the padding index.
    src = jax.random.randint(k_src, (B, T), 1, INPUT_DIM, dtype=jnp.int32)
    lengths = jnp.array([T, 5], dtype=jnp.int32)
    pos = jnp.arange(T)[None, :]
    src = jnp.where(pos < lengths[:, None], src, PADDING_IDX)

    hidden, cell = encoder_forward(src, lengths, params)
    hidden, cell = jax.block_until_ready((hidden, cell))

    h_ref, c_ref = reference_forward(src, lengths, params)
    assert hidden.shape == (NUM_LAYERS, B, HIDDEN_DIM)
    assert cell.shape == (NUM_LAYERS, B, HIDDEN_DIM)
    # Tolerance covers bf16 storage of xg0 / recurrent weights (math stays f32).
    assert jnp.allclose(hidden, h_ref, atol=1e-2, rtol=1e-2)
    assert jnp.allclose(cell, c_ref, atol=1e-2, rtol=1e-2)

    print("KERNEL_OK")
</pallas_src>

<mosaic_0001>
module attributes {stable_mosaic.version = 11 : i64} {
  func.func @lstm_encoder_kernel(%arg0: i32, %arg1: memref<8x16x128xbf16, #tpu.memory_space<vmem>>, %arg2: memref<16x1xi32, #tpu.memory_space<vmem>>, %arg3: memref<32x128xbf16, #tpu.memory_space<vmem>>, %arg4: memref<1x32x128xbf16, #tpu.memory_space<vmem>>, %arg5: memref<1x32x128xbf16, #tpu.memory_space<vmem>>, %arg6: memref<1x1x128xf32, #tpu.memory_space<vmem>>, %arg7: memref<16x128xf32, #tpu.memory_space<vmem>>) attributes {dimension_semantics = [#tpu.dimension_semantics<parallel>], iteration_bounds = array<i64: 1>, scalar_prefetch = 0 : i64, scratch_operands = 0 : i64, tpu.core_type = #tpu.core_type<tc>, window_params = [{transform_indices = @transform_0, window_bounds = array<i64: 8, 16, 128>}, {transform_indices = @transform_1, window_bounds = array<i64: 16, 1>}, {pipeline_mode = #tpu.pipeline_mode<synchronous>, transform_indices = @transform_2, window_bounds = array<i64: 32, 128>}, {pipeline_mode = #tpu.pipeline_mode<synchronous>, transform_indices = @transform_3, window_bounds = array<i64: 1, 32, 128>}, {pipeline_mode = #tpu.pipeline_mode<synchronous>, transform_indices = @transform_4, window_bounds = array<i64: 1, 32, 128>}, {pipeline_mode = #tpu.pipeline_mode<synchronous>, transform_indices = @transform_5, window_bounds = array<i64: 1, 1, 128>}, {transform_indices = @transform_6, window_bounds = array<i64: 16, 128>}]} {
    %c0 = arith.constant 0 : index
    %c0_0 = arith.constant 0 : index
    %0 = vector.load %arg2[%c0, %c0_0] : memref<16x1xi32, #tpu.memory_space<vmem>>, vector<16x1xi32>
    %c0_1 = arith.constant 0 : index
    %c0_2 = arith.constant 0 : index
    %1 = vector.load %arg3[%c0_1, %c0_2] : memref<32x128xbf16, #tpu.memory_space<vmem>>, vector<32x128xbf16>
    %c0_3 = arith.constant 0 : index
    %c0_4 = arith.constant 0 : index
    %c0_5 = arith.constant 0 : index
    %2 = vector.load %arg4[%c0_3, %c0_4, %c0_5] : memref<1x32x128xbf16, #tpu.memory_space<vmem>>, vector<1x32x128xbf16>
    %3 = vector.shape_cast %2 : vector<1x32x128xbf16> to vector<32x128xbf16>
    %c0_6 = arith.constant 0 : index
    %c0_7 = arith.constant 0 : index
    %c0_8 = arith.constant 0 : index
    %4 = vector.load %arg5[%c0_6, %c0_7, %c0_8] : memref<1x32x128xbf16, #tpu.memory_space<vmem>>, vector<1x32x128xbf16>
    %5 = vector.shape_cast %4 : vector<1x32x128xbf16> to vector<32x128xbf16>
    %c0_9 = arith.constant 0 : index
    %c0_10 = arith.constant 0 : index
    %c0_11 = arith.constant 0 : index
    %6 = vector.load %arg6[%c0_9, %c0_10, %c0_11] : memref<1x1x128xf32, #tpu.memory_space<vmem>>, vector<1x1x128xf32>
    %7 = vector.shape_cast %6 : vector<1x1x128xf32> to vector<1x128xf32>
    %8 = vector.shape_cast %7 : vector<1x128xf32> to vector<1x128xf32>
    %9 = vector.broadcast %8 : vector<1x128xf32> to vector<16x128xf32>
    %10 = tpu.iota {dimensions = array<i32: 1>} : vector<16x128xi32>
    %c96_i32 = arith.constant 96 : i32
    %11 = vector.broadcast %c96_i32 : i32 to vector<16x128xi32>
    %12 = arith.cmpi sge, %10, %11 : vector<16x128xi32>
    %cst = arith.constant 1.000000e+00 : f32
    %cst_12 = arith.constant 5.000000e-01 : f32
    %13 = vector.broadcast %cst : f32 to vector<16x128xf32>
    %14 = vector.broadcast %cst_12 : f32 to vector<16x128xf32>
    %15 = arith.select %12, %13, %14 : vector<16x128xi1>, vector<16x128xf32>
    %cst_13 = arith.constant 0.000000e+00 : f32
    %cst_14 = arith.constant 5.000000e-01 : f32
    %16 = vector.broadcast %cst_13 : f32 to vector<16x128xf32>
    %17 = vector.broadcast %cst_14 : f32 to vector<16x128xf32>
    %18 = arith.select %12, %16, %17 : vector<16x128xi1>, vector<16x128xf32>
    %c0_i32 = arith.constant 0 : i32
    %19 = vector.broadcast %c0_i32 : i32 to vector<16x1xi32>
    %20 = arith.cmpi sgt, %0, %19 : vector<16x1xi32>
    %21 = vector.shape_cast %20 : vector<16x1xi1> to vector<16x1xi1>
    %22 = vector.broadcast %21 : vector<16x1xi1> to vector<16x32xi1>
    %c1_i32 = arith.constant 1 : i32
    %23 = vector.broadcast %c1_i32 : i32 to vector<16x1xi32>
    %24 = arith.cmpi sgt, %0, %23 : vector<16x1xi32>
    %25 = vector.shape_cast %24 : vector<16x1xi1> to vector<16x1xi1>
    %26 = vector.broadcast %25 : vector<16x1xi1> to vector<16x32xi1>
    %c2_i32 = arith.constant 2 : i32
    %27 = vector.broadcast %c2_i32 : i32 to vector<16x1xi32>
    %28 = arith.cmpi sgt, %0, %27 : vector<16x1xi32>
    %29 = vector.shape_cast %28 : vector<16x1xi1> to vector<16x1xi1>
    %30 = vector.broadcast %29 : vector<16x1xi1> to vector<16x32xi1>
    %c3_i32 = arith.constant 3 : i32
    %31 = vector.broadcast %c3_i32 : i32 to vector<16x1xi32>
    %32 = arith.cmpi sgt, %0, %31 : vector<16x1xi32>
    %33 = vector.shape_cast %32 : vector<16x1xi1> to vector<16x1xi1>
    %34 = vector.broadcast %33 : vector<16x1xi1> to vector<16x32xi1>
    %c4_i32 = arith.constant 4 : i32
    %35 = vector.broadcast %c4_i32 : i32 to vector<16x1xi32>
    %36 = arith.cmpi sgt, %0, %35 : vector<16x1xi32>
    %37 = vector.shape_cast %36 : vector<16x1xi1> to vector<16x1xi1>
    %38 = vector.broadcast %37 : vector<16x1xi1> to vector<16x32xi1>
    %c5_i32 = arith.constant 5 : i32
    %39 = vector.broadcast %c5_i32 : i32 to vector<16x1xi32>
    %40 = arith.cmpi sgt, %0, %39 : vector<16x1xi32>
    %41 = vector.shape_cast %40 : vector<16x1xi1> to vector<16x1xi1>
    %42 = vector.broadcast %41 : vector<16x1xi1> to vector<16x32xi1>
    %c6_i32 = arith.constant 6 : i32
    %43 = vector.broadcast %c6_i32 : i32 to vector<16x1xi32>
    %44 = arith.cmpi sgt, %0, %43 : vector<16x1xi32>
    %45 = vector.shape_cast %44 : vector<16x1xi1> to vector<16x1xi1>
    %46 = vector.broadcast %45 : vector<16x1xi1> to vector<16x32xi1>
    %c7_i32 = arith.constant 7 : i32
    %47 = vector.broadcast %c7_i32 : i32 to vector<16x1xi32>
    %48 = arith.cmpi sgt, %0, %47 : vector<16x1xi32>
    %49 = vector.shape_cast %48 : vector<16x1xi1> to vector<16x1xi1>
    %50 = vector.broadcast %49 : vector<16x1xi1> to vector<16x32xi1>
    %cst_15 = arith.constant 0.000000e+00 : f32
    %51 = vector.broadcast %cst_15 : f32 to vector<16x32xf32>
    %cst_16 = arith.constant 0.000000e+00 : f32
    %52 = vector.broadcast %cst_16 : f32 to vector<16x32xf32>
    %cst_17 = arith.constant 0.000000e+00 : f32
    %53 = vector.broadcast %cst_17 : f32 to vector<16x32xf32>
    %cst_18 = arith.constant 0.000000e+00 : f32
    %54 = vector.broadcast %cst_18 : f32 to vector<16x32xf32>
    %c0_19 = arith.constant 0 : index
    %c0_20 = arith.constant 0 : index
    %c0_21 = arith.constant 0 : index
    %55 = vector.load %arg1[%c0_19, %c0_20, %c0_21] : memref<8x16x128xbf16, #tpu.memory_space<vmem>>, vector<1x16x128xbf16>
    %56 = vector.shape_cast %55 : vector<1x16x128xbf16> to vector<16x128xbf16>
    %57 = arith.extf %56 : vector<16x128xbf16> to vector<16x128xf32>
    %58 = arith.truncf %51 : vector<16x32xf32> to vector<16x32xbf16>
    %cst_22 = arith.constant dense<0.000000e+00> : vector<16x128xf32>
    %59 = tpu.matmul %58, %1, %cst_22 {dimension_numbers = #tpu.dot_dimension_numbers<[1], [0], [0], [1], [0, 0, 1, 1], [], []>} : vector<16x32xbf16>, vector<32x128xbf16>, vector<16x128xf32> -> vector<16x128xf32>
    %60 = arith.addf %57, %59 : vector<16x128xf32>
    %61 = arith.mulf %60, %15 : vector<16x128xf32>
    %62 = math.tanh %61 : vector<16x128xf32>
    %63 = arith.mulf %62, %15 : vector<16x128xf32>
    %64 = arith.addf %63, %18 : vector<16x128xf32>
    %65 = vector.extract_strided_slice %64 {offsets = [0, 0], sizes = [16, 32], strides = [1, 1]} : vector<16x128xf32> to vector<16x32xf32>
    %66 = vector.extract_strided_slice %64 {offsets = [0, 32], sizes = [16, 32], strides = [1, 1]} : vector<16x128xf32> to vector<16x32xf32>
    %67 = vector.extract_strided_slice %64 {offsets = [0, 64], sizes = [16, 32], strides = [1, 1]} : vector<16x128xf32> to vector<16x32xf32>
    %68 = vector.extract_strided_slice %64 {offsets = [0, 96], sizes = [16, 32], strides = [1, 1]} : vector<16x128xf32> to vector<16x32xf32>
    %69 = arith.mulf %66, %53 : vector<16x32xf32>
    %70 = arith.mulf %65, %68 : vector<16x32xf32>
    %71 = arith.addf %69, %70 : vector<16x32xf32>
    %72 = math.tanh %71 : vector<16x32xf32>
    %73 = arith.mulf %67, %72 : vector<16x32xf32>
    %74 = arith.select %22, %73, %51 : vector<16x32xi1>, vector<16x32xf32>
    %75 = arith.select %22, %71, %53 : vector<16x32xi1>, vector<16x32xf32>
    %76 = arith.truncf %74 : vector<16x32xf32> to vector<16x32xbf16>
    %cst_23 = arith.constant dense<0.000000e+00> : vector<16x128xf32>
    %77 = tpu.matmul %76, %3, %cst_23 {dimension_numbers = #tpu.dot_dimension_numbers<[1], [0], [0], [1], [0, 0, 1, 1], [], []>} : vector<16x32xbf16>, vector<32x128xbf16>, vector<16x128xf32> -> vector<16x128xf32>
    %78 = arith.truncf %52 : vector<16x32xf32> to vector<16x32xbf16>
    %cst_24 = arith.constant dense<0.000000e+00> : vector<16x128xf32>
    %79 = tpu.matmul %78, %5, %cst_24 {dimension_numbers = #tpu.dot_dimension_numbers<[1], [0], [0], [1], [0, 0, 1, 1], [], []>} : vector<16x32xbf16>, vector<32x128xbf16>, vector<16x128xf32> -> vector<16x128xf32>
    %80 = arith.addf %77, %79 : vector<16x128xf32>
    %81 = arith.addf %80, %9 : vector<16x128xf32>
    %82 = arith.mulf %81, %15 : vector<16x128xf32>
    %83 = math.tanh %82 : vector<16x128xf32>
    %84 = arith.mulf %83, %15 : vector<16x128xf32>
    %85 = arith.addf %84, %18 : vector<16x128xf32>
    %86 = vector.extract_strided_slice %85 {offsets = [0, 0], sizes = [16, 32], strides = [1, 1]} : vector<16x128xf32> to vector<16x32xf32>
    %87 = vector.extract_strided_slice %85 {offsets = [0, 32], sizes = [16, 32], strides = [1, 1]} : vector<16x128xf32> to vector<16x32xf32>
    %88 = vector.extract_strided_slice %85 {offsets = [0, 64], sizes = [16, 32], strides = [1, 1]} : vector<16x128xf32> to vector<16x32xf32>
    %89 = vector.extract_strided_slice %85 {offsets = [0, 96], sizes = [16, 32], strides = [1, 1]} : vector<16x128xf32> to vector<16x32xf32>
    %90 = arith.mulf %87, %54 : vector<16x32xf32>
    %91 = arith.mulf %86, %89 : vector<16x32xf32>
    %92 = arith.addf %90, %91 : vector<16x32xf32>
    %93 = math.tanh %92 : vector<16x32xf32>
    %94 = arith.mulf %88, %93 : vector<16x32xf32>
    %95 = arith.select %22, %94, %52 : vector<16x32xi1>, vector<16x32xf32>
    %96 = arith.select %22, %92, %54 : vector<16x32xi1>, vector<16x32xf32>
    %c1 = arith.constant 1 : index
    %c0_25 = arith.constant 0 : index
    %c0_26 = arith.constant 0 : index
    %97 = vector.load %arg1[%c1, %c0_25, %c0_26] : memref<8x16x128xbf16, #tpu.memory_space<vmem>>, vector<1x16x128xbf16>
    %98 = vector.shape_cast %97 : vector<1x16x128xbf16> to vector<16x128xbf16>
    %99 = arith.extf %98 : vector<16x128xbf16> to vector<16x128xf32>
    %100 = arith.truncf %74 : vector<16x32xf32> to vector<16x32xbf16>
    %cst_27 = arith.constant dense<0.000000e+00> : vector<16x128xf32>
    %101 = tpu.matmul %100, %1, %cst_27 {dimension_numbers = #tpu.dot_dimension_numbers<[1], [0], [0], [1], [0, 0, 1, 1], [], []>} : vector<16x32xbf16>, vector<32x128xbf16>, vector<16x128xf32> -> vector<16x128xf32>
    %102 = arith.addf %99, %101 : vector<16x128xf32>
    %103 = arith.mulf %102, %15 : vector<16x128xf32>
    %104 = math.tanh %103 : vector<16x128xf32>
    %105 = arith.mulf %104, %15 : vector<16x128xf32>
    %106 = arith.addf %105, %18 : vector<16x128xf32>
    %107 = vector.extract_strided_slice %106 {offsets = [0, 0], sizes = [16, 32], strides = [1, 1]} : vector<16x128xf32> to vector<16x32xf32>
    %108 = vector.extract_strided_slice %106 {offsets = [0, 32], sizes = [16, 32], strides = [1, 1]} : vector<16x128xf32> to vector<16x32xf32>
    %109 = vector.extract_strided_slice %106 {offsets = [0, 64], sizes = [16, 32], strides = [1, 1]} : vector<16x128xf32> to vector<16x32xf32>
    %110 = vector.extract_strided_slice %106 {offsets = [0, 96], sizes = [16, 32], strides = [1, 1]} : vector<16x128xf32> to vector<16x32xf32>
    %111 = arith.mulf %108, %75 : vector<16x32xf32>
    %112 = arith.mulf %107, %110 : vector<16x32xf32>
    %113 = arith.addf %111, %112 : vector<16x32xf32>
    %114 = math.tanh %113 : vector<16x32xf32>
    %115 = arith.mulf %109, %114 : vector<16x32xf32>
    %116 = arith.select %26, %115, %74 : vector<16x32xi1>, vector<16x32xf32>
    %117 = arith.select %26, %113, %75 : vector<16x32xi1>, vector<16x32xf32>
    %118 = arith.truncf %116 : vector<16x32xf32> to vector<16x32xbf16>
    %cst_28 = arith.constant dense<0.000000e+00> : vector<16x128xf32>
    %119 = tpu.matmul %118, %3, %cst_28 {dimension_numbers = #tpu.dot_dimension_numbers<[1], [0], [0], [1], [0, 0, 1, 1], [], []>} : vector<16x32xbf16>, vector<32x128xbf16>, vector<16x128xf32> -> vector<16x128xf32>
    %120 = arith.truncf %95 : vector<16x32xf32> to vector<16x32xbf16>
    %cst_29 = arith.constant dense<0.000000e+00> : vector<16x128xf32>
    %121 = tpu.matmul %120, %5, %cst_29 {dimension_numbers = #tpu.dot_dimension_numbers<[1], [0], [0], [1], [0, 0, 1, 1], [], []>} : vector<16x32xbf16>, vector<32x128xbf16>, vector<16x128xf32> -> vector<16x128xf32>
    %122 = arith.addf %119, %121 : vector<16x128xf32>
    %123 = arith.addf %122, %9 : vector<16x128xf32>
    %124 = arith.mulf %123, %15 : vector<16x128xf32>
    %125 = math.tanh %124 : vector<16x128xf32>
    %126 = arith.mulf %125, %15 : vector<16x128xf32>
    %127 = arith.addf %126, %18 : vector<16x128xf32>
    %128 = vector.extract_strided_slice %127 {offsets = [0, 0], sizes = [16, 32], strides = [1, 1]} : vector<16x128xf32> to vector<16x32xf32>
    %129 = vector.extract_strided_slice %127 {offsets = [0, 32], sizes = [16, 32], strides = [1, 1]} : vector<16x128xf32> to vector<16x32xf32>
    %130 = vector.extract_strided_slice %127 {offsets = [0, 64], sizes = [16, 32], strides = [1, 1]} : vector<16x128xf32> to vector<16x32xf32>
    %131 = vector.extract_strided_slice %127 {offsets = [0, 96], sizes = [16, 32], strides = [1, 1]} : vector<16x128xf32> to vector<16x32xf32>
    %132 = arith.mulf %129, %96 : vector<16x32xf32>
    %133 = arith.mulf %128, %131 : vector<16x32xf32>
    %134 = arith.addf %132, %133 : vector<16x32xf32>
    %135 = math.tanh %134 : vector<16x32xf32>
    %136 = arith.mulf %130, %135 : vector<16x32xf32>
    %137 = arith.select %26, %136, %95 : vector<16x32xi1>, vector<16x32xf32>
    %138 = arith.select %26, %134, %96 : vector<16x32xi1>, vector<16x32xf32>
    %c2 = arith.constant 2 : index
    %c0_30 = arith.constant 0 : index
    %c0_31 = arith.constant 0 : index
    %139 = vector.load %arg1[%c2, %c0_30, %c0_31] : memref<8x16x128xbf16, #tpu.memory_space<vmem>>, vector<1x16x128xbf16>
    %140 = vector.shape_cast %139 : vector<1x16x128xbf16> to vector<16x128xbf16>
    %141 = arith.extf %140 : vector<16x128xbf16> to vector<16x128xf32>
    %142 = arith.truncf %116 : vector<16x32xf32> to vector<16x32xbf16>
    %cst_32 = arith.constant dense<0.000000e+00> : vector<16x128xf32>
    %143 = tpu.matmul %142, %1, %cst_32 {dimension_numbers = #tpu.dot_dimension_numbers<[1], [0], [0], [1], [0, 0, 1, 1], [], []>} : vector<16x32xbf16>, vector<32x128xbf16>, vector<16x128xf32> -> vector<16x128xf32>
    %144 = arith.addf %141, %143 : vector<16x128xf32>
    %145 = arith.mulf %144, %15 : vector<16x128xf32>
    %146 = math.tanh %145 : vector<16x128xf32>
    %147 = arith.mulf %146, %15 : vector<16x128xf32>
    %148 = arith.addf %147, %18 : vector<16x128xf32>
    %149 = vector.extract_strided_slice %148 {offsets = [0, 0], sizes = [16, 32], strides = [1, 1]} : vector<16x128xf32> to vector<16x32xf32>
    %150 = vector.extract_strided_slice %148 {offsets = [0, 32], sizes = [16, 32], strides = [1, 1]} : vector<16x128xf32> to vector<16x32xf32>
    %151 = vector.extract_strided_slice %148 {offsets = [0, 64], sizes = [16, 32], strides = [1, 1]} : vector<16x128xf32> to vector<16x32xf32>
    %152 = vector.extract_strided_slice %148 {offsets = [0, 96], sizes = [16, 32], strides = [1, 1]} : vector<16x128xf32> to vector<16x32xf32>
    %153 = arith.mulf %150, %117 : vector<16x32xf32>
    %154 = arith.mulf %149, %152 : vector<16x32xf32>
    %155 = arith.addf %153, %154 : vector<16x32xf32>
    %156 = math.tanh %155 : vector<16x32xf32>
    %157 = arith.mulf %151, %156 : vector<16x32xf32>
    %158 = arith.select %30, %157, %116 : vector<16x32xi1>, vector<16x32xf32>
    %159 = arith.select %30, %155, %117 : vector<16x32xi1>, vector<16x32xf32>
    %160 = arith.truncf %158 : vector<16x32xf32> to vector<16x32xbf16>
    %cst_33 = arith.constant dense<0.000000e+00> : vector<16x128xf32>
    %161 = tpu.matmul %160, %3, %cst_33 {dimension_numbers = #tpu.dot_dimension_numbers<[1], [0], [0], [1], [0, 0, 1, 1], [], []>} : vector<16x32xbf16>, vector<32x128xbf16>, vector<16x128xf32> -> vector<16x128xf32>
    %162 = arith.truncf %137 : vector<16x32xf32> to vector<16x32xbf16>
    %cst_34 = arith.constant dense<0.000000e+00> : vector<16x128xf32>
    %163 = tpu.matmul %162, %5, %cst_34 {dimension_numbers = #tpu.dot_dimension_numbers<[1], [0], [0], [1], [0, 0, 1, 1], [], []>} : vector<16x32xbf16>, vector<32x128xbf16>, vector<16x128xf32> -> vector<16x128xf32>
    %164 = arith.addf %161, %163 : vector<16x128xf32>
    %165 = arith.addf %164, %9 : vector<16x128xf32>
    %166 = arith.mulf %165, %15 : vector<16x128xf32>
    %167 = math.tanh %166 : vector<16x128xf32>
    %168 = arith.mulf %167, %15 : vector<16x128xf32>
    %169 = arith.addf %168, %18 : vector<16x128xf32>
    %170 = vector.extract_strided_slice %169 {offsets = [0, 0], sizes = [16, 32], strides = [1, 1]} : vector<16x128xf32> to vector<16x32xf32>
    %171 = vector.extract_strided_slice %169 {offsets = [0, 32], sizes = [16, 32], strides = [1, 1]} : vector<16x128xf32> to vector<16x32xf32>
    %172 = vector.extract_strided_slice %169 {offsets = [0, 64], sizes = [16, 32], strides = [1, 1]} : vector<16x128xf32> to vector<16x32xf32>
    %173 = vector.extract_strided_slice %169 {offsets = [0, 96], sizes = [16, 32], strides = [1, 1]} : vector<16x128xf32> to vector<16x32xf32>
    %174 = arith.mulf %171, %138 : vector<16x32xf32>
    %175 = arith.mulf %170, %173 : vector<16x32xf32>
    %176 = arith.addf %174, %175 : vector<16x32xf32>
    %177 = math.tanh %176 : vector<16x32xf32>
    %178 = arith.mulf %172, %177 : vector<16x32xf32>
    %179 = arith.select %30, %178, %137 : vector<16x32xi1>, vector<16x32xf32>
    %180 = arith.select %30, %176, %138 : vector<16x32xi1>, vector<16x32xf32>
    %c3 = arith.constant 3 : index
    %c0_35 = arith.constant 0 : index
    %c0_36 = arith.constant 0 : index
    %181 = vector.load %arg1[%c3, %c0_35, %c0_36] : memref<8x16x128xbf16, #tpu.memory_space<vmem>>, vector<1x16x128xbf16>
    %182 = vector.shape_cast %181 : vector<1x16x128xbf16> to vector<16x128xbf16>
    %183 = arith.extf %182 : vector<16x128xbf16> to vector<16x128xf32>
    %184 = arith.truncf %158 : vector<16x32xf32> to vector<16x32xbf16>
    %cst_37 = arith.constant dense<0.000000e+00> : vector<16x128xf32>
    %185 = tpu.matmul %184, %1, %cst_37 {dimension_numbers = #tpu.dot_dimension_numbers<[1], [0], [0], [1], [0, 0, 1, 1], [], []>} : vector<16x32xbf16>, vector<32x128xbf16>, vector<16x128xf32> -> vector<16x128xf32>
    %186 = arith.addf %183, %185 : vector<16x128xf32>
    %187 = arith.mulf %186, %15 : vector<16x128xf32>
    %188 = math.tanh %187 : vector<16x128xf32>
    %189 = arith.mulf %188, %15 : vector<16x128xf32>
    %190 = arith.addf %189, %18 : vector<16x128xf32>
    %191 = vector.extract_strided_slice %190 {offsets = [0, 0], sizes = [16, 32], strides = [1, 1]} : vector<16x128xf32> to vector<16x32xf32>
    %192 = vector.extract_strided_slice %190 {offsets = [0, 32], sizes = [16, 32], strides = [1, 1]} : vector<16x128xf32> to vector<16x32xf32>
    %193 = vector.extract_strided_slice %190 {offsets = [0, 64], sizes = [16, 32], strides = [1, 1]} : vector<16x128xf32> to vector<16x32xf32>
    %194 = vector.extract_strided_slice %190 {offsets = [0, 96], sizes = [16, 32], strides = [1, 1]} : vector<16x128xf32> to vector<16x32xf32>
    %195 = arith.mulf %192, %159 : vector<16x32xf32>
    %196 = arith.mulf %191, %194 : vector<16x32xf32>
    %197 = arith.addf %195, %196 : vector<16x32xf32>
    %198 = math.tanh %197 : vector<16x32xf32>
    %199 = arith.mulf %193, %198 : vector<16x32xf32>
    %200 = arith.select %34, %199, %158 : vector<16x32xi1>, vector<16x32xf32>
    %201 = arith.select %34, %197, %159 : vector<16x32xi1>, vector<16x32xf32>
    %202 = arith.truncf %200 : vector<16x32xf32> to vector<16x32xbf16>
    %cst_38 = arith.constant dense<0.000000e+00> : vector<16x128xf32>
    %203 = tpu.matmul %202, %3, %cst_38 {dimension_numbers = #tpu.dot_dimension_numbers<[1], [0], [0], [1], [0, 0, 1, 1], [], []>} : vector<16x32xbf16>, vector<32x128xbf16>, vector<16x128xf32> -> vector<16x128xf32>
    %204 = arith.truncf %179 : vector<16x32xf32> to vector<16x32xbf16>
    %cst_39 = arith.constant dense<0.000000e+00> : vector<16x128xf32>
    %205 = tpu.matmul %204, %5, %cst_39 {dimension_numbers = #tpu.dot_dimension_numbers<[1], [0], [0], [1], [0, 0, 1, 1], [], []>} : vector<16x32xbf16>, vector<32x128xbf16>, vector<16x128xf32> -> vector<16x128xf32>
    %206 = arith.addf %203, %205 : vector<16x128xf32>
    %207 = arith.addf %206, %9 : vector<16x128xf32>
    %208 = arith.mulf %207, %15 : vector<16x128xf32>
    %209 = math.tanh %208 : vector<16x128xf32>
    %210 = arith.mulf %209, %15 : vector<16x128xf32>
    %211 = arith.addf %210, %18 : vector<16x128xf32>
    %212 = vector.extract_strided_slice %211 {offsets = [0, 0], sizes = [16, 32], strides = [1, 1]} : vector<16x128xf32> to vector<16x32xf32>
    %213 = vector.extract_strided_slice %211 {offsets = [0, 32], sizes = [16, 32], strides = [1, 1]} : vector<16x128xf32> to vector<16x32xf32>
    %214 = vector.extract_strided_slice %211 {offsets = [0, 64], sizes = [16, 32], strides = [1, 1]} : vector<16x128xf32> to vector<16x32xf32>
    %215 = vector.extract_strided_slice %211 {offsets = [0, 96], sizes = [16, 32], strides = [1, 1]} : vector<16x128xf32> to vector<16x32xf32>
    %216 = arith.mulf %213, %180 : vector<16x32xf32>
    %217 = arith.mulf %212, %215 : vector<16x32xf32>
    %218 = arith.addf %216, %217 : vector<16x32xf32>
    %219 = math.tanh %218 : vector<16x32xf32>
    %220 = arith.mulf %214, %219 : vector<16x32xf32>
    %221 = arith.select %34, %220, %179 : vector<16x32xi1>, vector<16x32xf32>
    %222 = arith.select %34, %218, %180 : vector<16x32xi1>, vector<16x32xf32>
    %c4 = arith.constant 4 : index
    %c0_40 = arith.constant 0 : index
    %c0_41 = arith.constant 0 : index
    %223 = vector.load %arg1[%c4, %c0_40, %c0_41] : memref<8x16x128xbf16, #tpu.memory_space<vmem>>, vector<1x16x128xbf16>
    %224 = vector.shape_cast %223 : vector<1x16x128xbf16> to vector<16x128xbf16>
    %225 = arith.extf %224 : vector<16x128xbf16> to vector<16x128xf32>
    %226 = arith.truncf %200 : vector<16x32xf32> to vector<16x32xbf16>
    %cst_42 = arith.constant dense<0.000000e+00> : vector<16x128xf32>
    %227 = tpu.matmul %226, %1, %cst_42 {dimension_numbers = #tpu.dot_dimension_numbers<[1], [0], [0], [1], [0, 0, 1, 1], [], []>} : vector<16x32xbf16>, vector<32x128xbf16>, vector<16x128xf32> -> vector<16x128xf32>
    %228 = arith.addf %225, %227 : vector<16x128xf32>
    %229 = arith.mulf %228, %15 : vector<16x128xf32>
    %230 = math.tanh %229 : vector<16x128xf32>
    %231 = arith.mulf %230, %15 : vector<16x128xf32>
    %232 = arith.addf %231, %18 : vector<16x128xf32>
    %233 = vector.extract_strided_slice %232 {offsets = [0, 0], sizes = [16, 32], strides = [1, 1]} : vector<16x128xf32> to vector<16x32xf32>
    %234 = vector.extract_strided_slice %232 {offsets = [0, 32], sizes = [16, 32], strides = [1, 1]} : vector<16x128xf32> to vector<16x32xf32>
    %235 = vector.extract_strided_slice %232 {offsets = [0, 64], sizes = [16, 32], strides = [1, 1]} : vector<16x128xf32> to vector<16x32xf32>
    %236 = vector.extract_strided_slice %232 {offsets = [0, 96], sizes = [16, 32], strides = [1, 1]} : vector<16x128xf32> to vector<16x32xf32>
    %237 = arith.mulf %234, %201 : vector<16x32xf32>
    %238 = arith.mulf %233, %236 : vector<16x32xf32>
    %239 = arith.addf %237, %238 : vector<16x32xf32>
    %240 = math.tanh %239 : vector<16x32xf32>
    %241 = arith.mulf %235, %240 : vector<16x32xf32>
    %242 = arith.select %38, %241, %200 : vector<16x32xi1>, vector<16x32xf32>
    %243 = arith.select %38, %239, %201 : vector<16x32xi1>, vector<16x32xf32>
    %244 = arith.truncf %242 : vector<16x32xf32> to vector<16x32xbf16>
    %cst_43 = arith.constant dense<0.000000e+00> : vector<16x128xf32>
    %245 = tpu.matmul %244, %3, %cst_43 {dimension_numbers = #tpu.dot_dimension_numbers<[1], [0], [0], [1], [0, 0, 1, 1], [], []>} : vector<16x32xbf16>, vector<32x128xbf16>, vector<16x128xf32> -> vector<16x128xf32>
    %246 = arith.truncf %221 : vector<16x32xf32> to vector<16x32xbf16>
    %cst_44 = arith.constant dense<0.000000e+00> : vector<16x128xf32>
    %247 = tpu.matmul %246, %5, %cst_44 {dimension_numbers = #tpu.dot_dimension_numbers<[1], [0], [0], [1], [0, 0, 1, 1], [], []>} : vector<16x32xbf16>, vector<32x128xbf16>, vector<16x128xf32> -> vector<16x128xf32>
    %248 = arith.addf %245, %247 : vector<16x128xf32>
    %249 = arith.addf %248, %9 : vector<16x128xf32>
    %250 = arith.mulf %249, %15 : vector<16x128xf32>
    %251 = math.tanh %250 : vector<16x128xf32>
    %252 = arith.mulf %251, %15 : vector<16x128xf32>
    %253 = arith.addf %252, %18 : vector<16x128xf32>
    %254 = vector.extract_strided_slice %253 {offsets = [0, 0], sizes = [16, 32], strides = [1, 1]} : vector<16x128xf32> to vector<16x32xf32>
    %255 = vector.extract_strided_slice %253 {offsets = [0, 32], sizes = [16, 32], strides = [1, 1]} : vector<16x128xf32> to vector<16x32xf32>
    %256 = vector.extract_strided_slice %253 {offsets = [0, 64], sizes = [16, 32], strides = [1, 1]} : vector<16x128xf32> to vector<16x32xf32>
    %257 = vector.extract_strided_slice %253 {offsets = [0, 96], sizes = [16, 32], strides = [1, 1]} : vector<16x128xf32> to vector<16x32xf32>
    %258 = arith.mulf %255, %222 : vector<16x32xf32>
    %259 = arith.mulf %254, %257 : vector<16x32xf32>
    %260 = arith.addf %258, %259 : vector<16x32xf32>
    %261 = math.tanh %260 : vector<16x32xf32>
    %262 = arith.mulf %256, %261 : vector<16x32xf32>
    %263 = arith.select %38, %262, %221 : vector<16x32xi1>, vector<16x32xf32>
    %264 = arith.select %38, %260, %222 : vector<16x32xi1>, vector<16x32xf32>
    %c5 = arith.constant 5 : index
    %c0_45 = arith.constant 0 : index
    %c0_46 = arith.constant 0 : index
    %265 = vector.load %arg1[%c5, %c0_45, %c0_46] : memref<8x16x128xbf16, #tpu.memory_space<vmem>>, vector<1x16x128xbf16>
    %266 = vector.shape_cast %265 : vector<1x16x128xbf16> to vector<16x128xbf16>
    %267 = arith.extf %266 : vector<16x128xbf16> to vector<16x128xf32>
    %268 = arith.truncf %242 : vector<16x32xf32> to vector<16x32xbf16>
    %cst_47 = arith.constant dense<0.000000e+00> : vector<16x128xf32>
    %269 = tpu.matmul %268, %1, %cst_47 {dimension_numbers = #tpu.dot_dimension_numbers<[1], [0], [0], [1], [0, 0, 1, 1], [], []>} : vector<16x32xbf16>, vector<32x128xbf16>, vector<16x128xf32> -> vector<16x128xf32>
    %270 = arith.addf %267, %269 : vector<16x128xf32>
    %271 = arith.mulf %270, %15 : vector<16x128xf32>
    %272 = math.tanh %271 : vector<16x128xf32>
    %273 = arith.mulf %272, %15 : vector<16x128xf32>
    %274 = arith.addf %273, %18 : vector<16x128xf32>
    %275 = vector.extract_strided_slice %274 {offsets = [0, 0], sizes = [16, 32], strides = [1, 1]} : vector<16x128xf32> to vector<16x32xf32>
    %276 = vector.extract_strided_slice %274 {offsets = [0, 32], sizes = [16, 32], strides = [1, 1]} : vector<16x128xf32> to vector<16x32xf32>
    %277 = vector.extract_strided_slice %274 {offsets = [0, 64], sizes = [16, 32], strides = [1, 1]} : vector<16x128xf32> to vector<16x32xf32>
    %278 = vector.extract_strided_slice %274 {offsets = [0, 96], sizes = [16, 32], strides = [1, 1]} : vector<16x128xf32> to vector<16x32xf32>
    %279 = arith.mulf %276, %243 : vector<16x32xf32>
    %280 = arith.mulf %275, %278 : vector<16x32xf32>
    %281 = arith.addf %279, %280 : vector<16x32xf32>
    %282 = math.tanh %281 : vector<16x32xf32>
    %283 = arith.mulf %277, %282 : vector<16x32xf32>
    %284 = arith.select %42, %283, %242 : vector<16x32xi1>, vector<16x32xf32>
    %285 = arith.select %42, %281, %243 : vector<16x32xi1>, vector<16x32xf32>
    %286 = arith.truncf %284 : vector<16x32xf32> to vector<16x32xbf16>
    %cst_48 = arith.constant dense<0.000000e+00> : vector<16x128xf32>
    %287 = tpu.matmul %286, %3, %cst_48 {dimension_numbers = #tpu.dot_dimension_numbers<[1], [0], [0], [1], [0, 0, 1, 1], [], []>} : vector<16x32xbf16>, vector<32x128xbf16>, vector<16x128xf32> -> vector<16x128xf32>
    %288 = arith.truncf %263 : vector<16x32xf32> to vector<16x32xbf16>
    %cst_49 = arith.constant dense<0.000000e+00> : vector<16x128xf32>
    %289 = tpu.matmul %288, %5, %cst_49 {dimension_numbers = #tpu.dot_dimension_numbers<[1], [0], [0], [1], [0, 0, 1, 1], [], []>} : vector<16x32xbf16>, vector<32x128xbf16>, vector<16x128xf32> -> vector<16x128xf32>
    %290 = arith.addf %287, %289 : vector<16x128xf32>
    %291 = arith.addf %290, %9 : vector<16x128xf32>
    %292 = arith.mulf %291, %15 : vector<16x128xf32>
    %293 = math.tanh %292 : vector<16x128xf32>
    %294 = arith.mulf %293, %15 : vector<16x128xf32>
    %295 = arith.addf %294, %18 : vector<16x128xf32>
    %296 = vector.extract_strided_slice %295 {offsets = [0, 0], sizes = [16, 32], strides = [1, 1]} : vector<16x128xf32> to vector<16x32xf32>
    %297 = vector.extract_strided_slice %295 {offsets = [0, 32], sizes = [16, 32], strides = [1, 1]} : vector<16x128xf32> to vector<16x32xf32>
    %298 = vector.extract_strided_slice %295 {offsets = [0, 64], sizes = [16, 32], strides = [1, 1]} : vector<16x128xf32> to vector<16x32xf32>
    %299 = vector.extract_strided_slice %295 {offsets = [0, 96], sizes = [16, 32], strides = [1, 1]} : vector<16x128xf32> to vector<16x32xf32>
    %300 = arith.mulf %297, %264 : vector<16x32xf32>
    %301 = arith.mulf %296, %299 : vector<16x32xf32>
    %302 = arith.addf %300, %301 : vector<16x32xf32>
    %303 = math.tanh %302 : vector<16x32xf32>
    %304 = arith.mulf %298, %303 : vector<16x32xf32>
    %305 = arith.select %42, %304, %263 : vector<16x32xi1>, vector<16x32xf32>
    %306 = arith.select %42, %302, %264 : vector<16x32xi1>, vector<16x32xf32>
    %c6 = arith.constant 6 : index
    %c0_50 = arith.constant 0 : index
    %c0_51 = arith.constant 0 : index
    %307 = vector.load %arg1[%c6, %c0_50, %c0_51] : memref<8x16x128xbf16, #tpu.memory_space<vmem>>, vector<1x16x128xbf16>
    %308 = vector.shape_cast %307 : vector<1x16x128xbf16> to vector<16x128xbf16>
    %309 = arith.extf %308 : vector<16x128xbf16> to vector<16x128xf32>
    %310 = arith.truncf %284 : vector<16x32xf32> to vector<16x32xbf16>
    %cst_52 = arith.constant dense<0.000000e+00> : vector<16x128xf32>
    %311 = tpu.matmul %310, %1, %cst_52 {dimension_numbers = #tpu.dot_dimension_numbers<[1], [0], [0], [1], [0, 0, 1, 1], [], []>} : vector<16x32xbf16>, vector<32x128xbf16>, vector<16x128xf32> -> vector<16x128xf32>
    %312 = arith.addf %309, %311 : vector<16x128xf32>
    %313 = arith.mulf %312, %15 : vector<16x128xf32>
    %314 = math.tanh %313 : vector<16x128xf32>
    %315 = arith.mulf %314, %15 : vector<16x128xf32>
    %316 = arith.addf %315, %18 : vector<16x128xf32>
    %317 = vector.extract_strided_slice %316 {offsets = [0, 0], sizes = [16, 32], strides = [1, 1]} : vector<16x128xf32> to vector<16x32xf32>
    %318 = vector.extract_strided_slice %316 {offsets = [0, 32], sizes = [16, 32], strides = [1, 1]} : vector<16x128xf32> to vector<16x32xf32>
    %319 = vector.extract_strided_slice %316 {offsets = [0, 64], sizes = [16, 32], strides = [1, 1]} : vector<16x128xf32> to vector<16x32xf32>
    %320 = vector.extract_strided_slice %316 {offsets = [0, 96], sizes = [16, 32], strides = [1, 1]} : vector<16x128xf32> to vector<16x32xf32>
    %321 = arith.mulf %318, %285 : vector<16x32xf32>
    %322 = arith.mulf %317, %320 : vector<16x32xf32>
    %323 = arith.addf %321, %322 : vector<16x32xf32>
    %324 = math.tanh %323 : vector<16x32xf32>
    %325 = arith.mulf %319, %324 : vector<16x32xf32>
    %326 = arith.select %46, %325, %284 : vector<16x32xi1>, vector<16x32xf32>
    %327 = arith.select %46, %323, %285 : vector<16x32xi1>, vector<16x32xf32>
    %328 = arith.truncf %326 : vector<16x32xf32> to vector<16x32xbf16>
    %cst_53 = arith.constant dense<0.000000e+00> : vector<16x128xf32>
    %329 = tpu.matmul %328, %3, %cst_53 {dimension_numbers = #tpu.dot_dimension_numbers<[1], [0], [0], [1], [0, 0, 1, 1], [], []>} : vector<16x32xbf16>, vector<32x128xbf16>, vector<16x128xf32> -> vector<16x128xf32>
    %330 = arith.truncf %305 : vector<16x32xf32> to vector<16x32xbf16>
    %cst_54 = arith.constant dense<0.000000e+00> : vector<16x128xf32>
    %331 = tpu.matmul %330, %5, %cst_54 {dimension_numbers = #tpu.dot_dimension_numbers<[1], [0], [0], [1], [0, 0, 1, 1], [], []>} : vector<16x32xbf16>, vector<32x128xbf16>, vector<16x128xf32> -> vector<16x128xf32>
    %332 = arith.addf %329, %331 : vector<16x128xf32>
    %333 = arith.addf %332, %9 : vector<16x128xf32>
    %334 = arith.mulf %333, %15 : vector<16x128xf32>
    %335 = math.tanh %334 : vector<16x128xf32>
    %336 = arith.mulf %335, %15 : vector<16x128xf32>
    %337 = arith.addf %336, %18 : vector<16x128xf32>
    %338 = vector.extract_strided_slice %337 {offsets = [0, 0], sizes = [16, 32], strides = [1, 1]} : vector<16x128xf32> to vector<16x32xf32>
    %339 = vector.extract_strided_slice %337 {offsets = [0, 32], sizes = [16, 32], strides = [1, 1]} : vector<16x128xf32> to vector<16x32xf32>
    %340 = vector.extract_strided_slice %337 {offsets = [0, 64], sizes = [16, 32], strides = [1, 1]} : vector<16x128xf32> to vector<16x32xf32>
    %341 = vector.extract_strided_slice %337 {offsets = [0, 96], sizes = [16, 32], strides = [1, 1]} : vector<16x128xf32> to vector<16x32xf32>
    %342 = arith.mulf %339, %306 : vector<16x32xf32>
    %343 = arith.mulf %338, %341 : vector<16x32xf32>
    %344 = arith.addf %342, %343 : vector<16x32xf32>
    %345 = math.tanh %344 : vector<16x32xf32>
    %346 = arith.mulf %340, %345 : vector<16x32xf32>
    %347 = arith.select %46, %346, %305 : vector<16x32xi1>, vector<16x32xf32>
    %348 = arith.select %46, %344, %306 : vector<16x32xi1>, vector<16x32xf32>
    %c7 = arith.constant 7 : index
    %c0_55 = arith.constant 0 : index
    %c0_56 = arith.constant 0 : index
    %349 = vector.load %arg1[%c7, %c0_55, %c0_56] : memref<8x16x128xbf16, #tpu.memory_space<vmem>>, vector<1x16x128xbf16>
    %350 = vector.shape_cast %349 : vector<1x16x128xbf16> to vector<16x128xbf16>
    %351 = arith.extf %350 : vector<16x128xbf16> to vector<16x128xf32>
    %352 = arith.truncf %326 : vector<16x32xf32> to vector<16x32xbf16>
    %cst_57 = arith.constant dense<0.000000e+00> : vector<16x128xf32>
    %353 = tpu.matmul %352, %1, %cst_57 {dimension_numbers = #tpu.dot_dimension_numbers<[1], [0], [0], [1], [0, 0, 1, 1], [], []>} : vector<16x32xbf16>, vector<32x128xbf16>, vector<16x128xf32> -> vector<16x128xf32>
    %354 = arith.addf %351, %353 : vector<16x128xf32>
    %355 = arith.mulf %354, %15 : vector<16x128xf32>
    %356 = math.tanh %355 : vector<16x128xf32>
    %357 = arith.mulf %356, %15 : vector<16x128xf32>
    %358 = arith.addf %357, %18 : vector<16x128xf32>
    %359 = vector.extract_strided_slice %358 {offsets = [0, 0], sizes = [16, 32], strides = [1, 1]} : vector<16x128xf32> to vector<16x32xf32>
    %360 = vector.extract_strided_slice %358 {offsets = [0, 32], sizes = [16, 32], strides = [1, 1]} : vector<16x128xf32> to vector<16x32xf32>
    %361 = vector.extract_strided_slice %358 {offsets = [0, 64], sizes = [16, 32], strides = [1, 1]} : vector<16x128xf32> to vector<16x32xf32>
    %362 = vector.extract_strided_slice %358 {offsets = [0, 96], sizes = [16, 32], strides = [1, 1]} : vector<16x128xf32> to vector<16x32xf32>
    %363 = arith.mulf %360, %327 : vector<16x32xf32>
    %364 = arith.mulf %359, %362 : vector<16x32xf32>
    %365 = arith.addf %363, %364 : vector<16x32xf32>
    %366 = math.tanh %365 : vector<16x32xf32>
    %367 = arith.mulf %361, %366 : vector<16x32xf32>
    %368 = arith.select %50, %367, %326 : vector<16x32xi1>, vector<16x32xf32>
    %369 = arith.select %50, %365, %327 : vector<16x32xi1>, vector<16x32xf32>
    %370 = arith.truncf %368 : vector<16x32xf32> to vector<16x32xbf16>
    %cst_58 = arith.constant dense<0.000000e+00> : vector<16x128xf32>
    %371 = tpu.matmul %370, %3, %cst_58 {dimension_numbers = #tpu.dot_dimension_numbers<[1], [0], [0], [1], [0, 0, 1, 1], [], []>} : vector<16x32xbf16>, vector<32x128xbf16>, vector<16x128xf32> -> vector<16x128xf32>
    %372 = arith.truncf %347 : vector<16x32xf32> to vector<16x32xbf16>
    %cst_59 = arith.constant dense<0.000000e+00> : vector<16x128xf32>
    %373 = tpu.matmul %372, %5, %cst_59 {dimension_numbers = #tpu.dot_dimension_numbers<[1], [0], [0], [1], [0, 0, 1, 1], [], []>} : vector<16x32xbf16>, vector<32x128xbf16>, vector<16x128xf32> -> vector<16x128xf32>
    %374 = arith.addf %371, %373 : vector<16x128xf32>
    %375 = arith.addf %374, %9 : vector<16x128xf32>
    %376 = arith.mulf %375, %15 : vector<16x128xf32>
    %377 = math.tanh %376 : vector<16x128xf32>
    %378 = arith.mulf %377, %15 : vector<16x128xf32>
    %379 = arith.addf %378, %18 : vector<16x128xf32>
    %380 = vector.extract_strided_slice %379 {offsets = [0, 0], sizes = [16, 32], strides = [1, 1]} : vector<16x128xf32> to vector<16x32xf32>
    %381 = vector.extract_strided_slice %379 {offsets = [0, 32], sizes = [16, 32], strides = [1, 1]} : vector<16x128xf32> to vector<16x32xf32>
    %382 = vector.extract_strided_slice %379 {offsets = [0, 64], sizes = [16, 32], strides = [1, 1]} : vector<16x128xf32> to vector<16x32xf32>
    %383 = vector.extract_strided_slice %379 {offsets = [0, 96], sizes = [16, 32], strides = [1, 1]} : vector<16x128xf32> to vector<16x32xf32>
    %384 = arith.mulf %381, %348 : vector<16x32xf32>
    %385 = arith.mulf %380, %383 : vector<16x32xf32>
    %386 = arith.addf %384, %385 : vector<16x32xf32>
    %387 = math.tanh %386 : vector<16x32xf32>
    %388 = arith.mulf %382, %387 : vector<16x32xf32>
    %389 = arith.select %50, %388, %347 : vector<16x32xi1>, vector<16x32xf32>
    %390 = arith.select %50, %386, %348 : vector<16x32xi1>, vector<16x32xf32>
    %391 = tpu.concatenate %368, %389, %369, %390 in 1 : vector<16x32xf32>, vector<16x32xf32>, vector<16x32xf32>, vector<16x32xf32> -> vector<16x128xf32>
    %c0_60 = arith.constant 0 : index
    %c0_61 = arith.constant 0 : index
    %392 = vector.load %arg7[%c0_60, %c0_61] : memref<16x128xf32, #tpu.memory_space<vmem>>, vector<16x128xf32>
    tpu.vector_store %arg7[%c0_60, %c0_61], %391 {strides = array<i32>} : memref<16x128xf32, #tpu.memory_space<vmem>>, vector<16x128xf32>,
    return
  }
  func.func @transform_0(%arg0: i32) -> (i32, i32, i32) {
    %c0_i32 = arith.constant 0 : i32
    %c0_i32_0 = arith.constant 0 : i32
    %c0_i32_1 = arith.constant 0 : i32
    return %c0_i32, %arg0, %c0_i32_0 : i32, i32, i32
  }
  func.func @transform_1(%arg0: i32) -> (i32, i32) {
    %c0_i32 = arith.constant 0 : i32
    %c0_i32_0 = arith.constant 0 : i32
    return %arg0, %c0_i32 : i32, i32
  }
  func.func @transform_2(%arg0: i32) -> (i32, i32) {
    %c0_i32 = arith.constant 0 : i32
    %c0_i32_0 = arith.constant 0 : i32
    %c0_i32_1 = arith.constant 0 : i32
    return %c0_i32, %c0_i32_0 : i32, i32
  }
  func.func @transform_3(%arg0: i32) -> (i32, i32, i32) {
    %c0_i32 = arith.constant 0 : i32
    %c0_i32_0 = arith.constant 0 : i32
    %c0_i32_1 = arith.constant 0 : i32
    %c0_i32_2 = arith.constant 0 : i32
    return %c0_i32, %c0_i32_0, %c0_i32_1 : i32, i32, i32
  }
  func.func @transform_4(%arg0: i32) -> (i32, i32, i32) {
    %c0_i32 = arith.constant 0 : i32
    %c0_i32_0 = arith.constant 0 : i32
    %c0_i32_1 = arith.constant 0 : i32
    %c0_i32_2 = arith.constant 0 : i32
    return %c0_i32, %c0_i32_0, %c0_i32_1 : i32, i32, i32
  }
  func.func @transform_5(%arg0: i32) -> (i32, i32, i32) {
    %c0_i32 = arith.constant 0 : i32
    %c0_i32_0 = arith.constant 0 : i32
    %c0_i32_1 = arith.constant 0 : i32
    %c0_i32_2 = arith.constant 0 : i32
    return %c0_i32, %c0_i32_0, %c0_i32_1 : i32, i32, i32
  }
  func.func @transform_6(%arg0: i32) -> (i32, i32) {
    %c0_i32 = arith.constant 0 : i32
    %c0_i32_0 = arith.constant 0 : i32
    return %arg0, %c0_i32 : i32, i32
  }
}

</mosaic_0001>

<bundles_post_ra>
// kernel: tpu_custom_call.1
= control target key start
LH: loop header
LB: loop body
LE: loop exit
PB: predicated region body
PF: predicated region fallthrough
CT: control target
= control target key end

     0   :  { %11 = vsyncpa [#allocation3], 0  ;;  %s2905_s0 = inlined_call_operand.hbm [shape: bf16[8,16,128], index: 0, kind: input, shape index: {}]   ;;  %s2906_s1 = inlined_call_operand.vmem [shape: s32[16,1], index: 1, kind: input, shape index: {}]   ;;  %s2907_s2 = inlined_call_operand.vmem [shape: bf16[32,128], index: 2, kind: input, shape index: {}]   ;;  %s2908_s3 = inlined_call_operand.hbm [shape: bf16[1,32,128], index: 3, kind: input, shape index: {}]   ;;  %s2909_s4 = inlined_call_operand.hbm [shape: bf16[1,32,128], index: 4, kind: input, shape index: {}]   ;;  %s2910_s5 = inlined_call_operand.vmem [shape: f32[1,1,128], index: 5, kind: input, shape index: {}]   ;;  %s2911_s6 = inlined_call_operand.hbm [shape: f32[16,128], index: 6, kind: output, shape index: {}]  }
   0x1   :  { %12 = vsyncpa [#allocation6], 0 }
   0x2   :  { %13 = vsyncpa [#allocation4], 0  ;;  %s35_s23 = sshll.u32 %s2908_s3, 4  ;;  %s1876_s24 = smov [#allocation5]   ;;  %s36_s23 = int_to_ptr.hbm [resolvable:$true] %s35_s23 }
   0x3   :  { %s37_s25 = sshll.u32 %s1876_s24, 4  ;;  %s18_s28 = sshll.u32 %s2905_s0, 4  ;;  %s38_s25 = int_to_ptr.vmem [resolvable:$true] %s37_s25  ;;  %s19_s28 = int_to_ptr.hbm [resolvable:$true] %s18_s28 }
   0x4   :  { %s1877_s29 = smov 64   ;;  %s1878_s30 = smov 4  }
   0x5   :  { %43 = dma.hbm_to_vmem [thread:$0]  %s36_s23, 256, %s38_s25, [#allocation6], %s1877_s29, %s1877_s29, %s1878_s30  }
   0x6   :  { %s1879_s7 = smov [#allocation2]   ;;  %s48_s3 = sshll.u32 %s2909_s4, 4  ;;  %s49_s3 = int_to_ptr.hbm [resolvable:$true] %s48_s3 }
   0x7   :  { %s20_s8 = sshll.u32 %s1879_s7, 4  ;;  %s1880_s11 = smov [#allocation7]   ;;  %s21_s8 = int_to_ptr.vmem [resolvable:$true] %s20_s8 }
   0x8   :  { %26 = dma.hbm_to_vmem [thread:$0]  %s19_s28, 1024, %s21_s8, [#allocation3], %s1877_s29, %s1877_s29, %s1878_s30  }
   0x9   :  { %s50_s12 = sshll.u32 %s1880_s11, 4  ;;  %s51_s12 = int_to_ptr.vmem [resolvable:$true] %s50_s12 }
   0xa   :  { %56 = dma.hbm_to_vmem [thread:$0]  %s49_s3, 256, %s51_s12, [#allocation6], %s1877_s29, %s1877_s29, %s1878_s30  }
   0xb   :  { %1870 = dma.done.wait [#allocation3], 1024  }
   0xc   :  { %1871 = vsyncadd [#allocation3], 4294966272 }
   0xd   :  { %1872 = dma.done.wait [#allocation6], 512  }
   0xe   :  { %1873 = vsyncadd [#allocation6], 4294966784  ;;  %v1881_v0 = vmov 0   ;;  %v1944_v1 = vld [vmem:[%s2907_s2 + $0x8] sm:$0xff]  ;;  %v1950_v2 = vld [vmem:[%s2907_s2] sm:$0xff]  ;;  %v90_v3 = vlaneseq  ;;  %v1882_v7 = vmov 0.5  }
   0xf   :  { %1637 = vset.pattern.permute.xlu0 %v1881_v0  ;;  %1638 = vset.pattern.permute.xlu1 %v1881_v0  ;;  %v1594_v5 = vld [vmem:[#allocation2] sm:$0xff]   ;;  %s1883_s15 = smov 32   ;;  %v1979_v29 = vld [vmem:[%s2906_s1 + $0x8] sm:$0xff]  ;;  %v1992_v39 = vld [vmem:[#allocation7 + $0x8] sm:$0xff]  ;;  %vm207_vm5 = vcmask 261120   ;;  %s1885_s7 = smov [#allocation8]  }
  0x10   :  { %1639 = vset.pattern.permute.xlu2 %v1881_v0  ;;  %217 = vmatpush.bf16.msra.mxu0 %v1944_v1  ;;  %v91_v4 = vand.u32 127, %v90_v3  ;;  %v1595_v6 = vunpack.c.l.bf16 %v1594_v5  ;;  %v1596_v12 = vunpack.c.h.bf16 %v1594_v5  ;;  %v1971_v23 = vld [vmem:[%s2906_s1] sm:$0xff]  ;;  %vm96_vm2 = vcmp.gt.s32.totalorder %v1979_v29, 0  ;;  %v1994_v40 = vld [vmem:[#allocation5 + $0x8] sm:$0xff]  ;;  %v1998_v41 = vld [vmem:[#allocation7] sm:$0xff]  ;;  %s1525_s8 = sshll.u32 %s1885_s7, 4  ;;  %s1526_s8 = int_to_ptr.vmem [resolvable:$true] %s1525_s8 }
  0x11   :  { %391 = vmatpush.bf16.msra.mxu3 %v1944_v1  ;;  %vm95_vm1 = vcmp.gt.s32.totalorder %v1971_v23, 0  ;;  %v98_v30 = vsel %vm96_vm2, 1, %v1881_v0  ;;  %292 = vmatpush.bf16.msra.mxu1 %v1992_v39  ;;  %v2000_v42 = vld [vmem:[#allocation5] sm:$0xff]  ;;  %v1598_v53 = vld [vmem:[#allocation2 + $0x8] sm:$0xff]   ;;  %vm107_vm6 = vcmp.gt.s32.totalorder %v1971_v23, 1  ;;  %vm108_vm7 = vcmp.gt.s32.totalorder %v1979_v29, 1 }
  0x12   :  { %vm92_vm0 = vcmp.ge.s32.totalorder %v91_v4, 96  ;;  %v97_v24 = vsel %vm95_vm1, 1, %v1881_v0  ;;  %324 = vmatpush.bf16.msra.mxu2 %v1994_v40  ;;  %v1599_v55 = vunpack.c.l.bf16 %v1598_v53  ;;  %v2043_v56 = vld [vmem:[%s2910_s5] ss:$0 sm:$0xff]  ;;  %v1600_v3 = vunpack.c.h.bf16 %v1598_v53  ;;  %s1886_s3 = smov 128   ;;  %s1887_s11 = smov 8  }
  0x13   :  { %v1956_v8 = vsel %vm92_vm0, 1.0, %v1882_v7  ;;  %v1960_v17 = vsel %vm92_vm0, 0.0, %v1882_v7  ;;  %vm120_vm10 = vcmp.gt.s32.totalorder %v1979_v29, 2  ;;  %vm119_vm11 = vcmp.gt.s32.totalorder %v1971_v23, 2 }
  0x14   :  { %218 = vmatpush.bf16.msra.mxu0 %v1950_v2  ;;  %vm132_vm14 = vcmp.gt.s32.totalorder %v1979_v29, 3  ;;  %vm131_vm15 = vcmp.gt.s32.totalorder %v1971_v23, 3  ;;  %vm143_vm2 = vcmp.gt.s32.totalorder %v1971_v23, 4 }
  0x15   :  { %392 = vmatpush.bf16.msra.mxu3 %v1950_v2  ;;  %293 = vmatpush.bf16.msra.mxu1 %v1998_v41 }
  0x16   :  { %325 = vmatpush.bf16.msra.mxu2 %v2000_v42 }
  0x17   :  { %219 = vmatmul.bf16.vlgmr.msra.gmra.mxu0 %v1881_v0 }
  0x18   :  { %461 = vmatpush.bf16.msrb.mxu0 %v1992_v39  ;;  %294 = vmatmul.bf16.vlgmr.msra.gmra.mxu1 %v1881_v0 }
  0x19   :  { %618 = vmatpush.bf16.msrb.mxu3 %v1992_v39  ;;  %481 = vmatpush.bf16.msrb.mxu1 %v1994_v40 }
  0x1a   :  { %548 = vmatpush.bf16.msrb.mxu2 %v1944_v1 }
  0x1c   :  { %462 = vmatpush.bf16.msrb.mxu0 %v1998_v41 }
  0x1d   :  { %619 = vmatpush.bf16.msrb.mxu3 %v1998_v41  ;;  %482 = vmatpush.bf16.msrb.mxu1 %v2000_v42 }
  0x1e   :  { %549 = vmatpush.bf16.msrb.mxu2 %v1950_v2 }
  0x20   :  { %638 = vmatpush.bf16.msra.mxu0 %v1994_v40 }
  0x21   :  { %705 = vmatpush.bf16.msra.mxu1 %v1944_v1 }
  0x24   :  { %639 = vmatpush.bf16.msra.mxu0 %v2000_v42 }
  0x25   :  { %706 = vmatpush.bf16.msra.mxu1 %v1950_v2 }
  0x94   :  { %v220_v9 = vpop.f32.mrf.mxu0 }
  0x95   :  { %v225_v10 = vadd.f32 %v1595_v6, %v220_v9  ;;  %v295_v54 = vpop.f32.mrf.mxu1 }
  0x97   :  { %v227_v11 = vmul.f32 %v225_v10, %v1956_v8 }
  0x99   :  { %1641 = vtanh.f32 %v227_v11 }
  0x9c   :  { %v222_v13 = vpop.f32.mrf.mxu0 }
  0x9d   :  { %v226_v14 = vadd.f32 %v1596_v12, %v222_v13  ;;  %v297_v4 = vpop.f32.mrf.mxu1 }
  0x9f   :  { %v1642_v15 = vpop.eup %1641  ;;  %v228_v16 = vmul.f32 %v226_v14, %v1956_v8 }
  0xa0   :  { %v231_v18 = vmul.f32 %v1642_v15, %v1956_v8 }
  0xa1   :  { %1643 = vtanh.f32 %v228_v16 }
  0xa2   :  { %v233_v19 = vadd.f32 %v231_v18, %v1960_v17 }
  0xa4   :  { %239 = vrot.lane.b32.xlu0 %v233_v19, %s1883_s15  ;;  %v235_v31 = vmul.f32 0.0, %v233_v19 }
  0xa7   :  { %v1644_v20 = vpop.eup %1643 }
  0xa8   :  { %v232_v21 = vmul.f32 %v1644_v20, %v1956_v8 }
  0xaa   :  { %v234_v22 = vadd.f32 %v232_v21, %v1960_v17 }
  0xac   :  { %241 = vrot.lane.b32.xlu0 %v234_v22, %s1883_s15  ;;  %v236_v34 = vmul.f32 0.0, %v234_v22 }
  0xb4   :  { %100 = vperm.xlu0 %1637, %v97_v24  }
 0x116   :  { %v240_v25 = vpop.permute.xlu0 %239 }
 0x117   :  { %v245_v26 = vmul.f32 %v240_v25, %v233_v19 }
 0x119   :  { %249 = vrot.lane.b32.xlu1 %v245_v26, %s1883_s15 }
 0x11e   :  { %v242_v27 = vpop.permute.xlu0 %241 }
 0x11f   :  { %v246_v28 = vmul.f32 %v242_v27, %v234_v22 }
 0x121   :  { %251 = vrot.lane.b32.xlu1 %v246_v28, %s1883_s15 }
 0x126   :  { %v2017_v44 = vpop.permute.xlu0 %100 }
 0x127   :  { %vm105_vm3 = vcmp.eq.s32.totalorder %v2017_v44, 1 }
 0x129   :  { %103 = vperm.xlu1 %1638, %v98_v30  }
 0x18b   :  { %v250_v32 = vpop.permute.xlu1 %249 }
 0x18c   :  { %v1984_v33 = vadd.f32 %v250_v32, %v235_v31 }
 0x18e   :  { %1645 = vtanh.f32 %v1984_v33 }
 0x193   :  { %v252_v35 = vpop.permute.xlu1 %251 }
 0x194   :  { %v1646_v36 = vpop.eup %1645  ;;  %v1987_v37 = vadd.f32 %v252_v35, %v236_v34 }
 0x195   :  { %261 = vrot.lane.b32.xlu2 %v1646_v36, %s1883_s15 }
 0x196   :  { %1647 = vtanh.f32 %v1987_v37 }
 0x19b   :  { %v2019_v45 = vpop.permute.xlu1 %103 }
 0x19c   :  { %v1648_v38 = vpop.eup %1647  ;;  %vm106_vm4 = vcmp.eq.s32.totalorder %v2019_v45, 1 }
 0x19d   :  { %263 = vrot.lane.b32.xlu2 %v1648_v38, %s1883_s15 }
 0x1ef   :  { %v262_v43 = vpop.permute.xlu2 %261 }
 0x1f0   :  { %v267_v46 = vmul.f32 %v262_v43, %v233_v19 }
 0x1f2   :  { %v2025_v49 = vsel %vm105_vm3, %v267_v46, 0.0 }
 0x1f7   :  { %v264_v47 = vpop.permute.xlu2 %263 }
 0x1f8   :  { %v268_v48 = vmul.f32 %v264_v47, %v234_v22  ;;  %v2077_v47 = vsel %vm106_vm4, %v1987_v37, 0.0  ;;  %v2092_v37 = vsel %vm105_vm3, %v1984_v33, 0.0  ;;  %v110_v33 = vsel %vm108_vm7, 1, %v1881_v0 }
 0x1fa   :  { %v2029_v50 = vsel %vm106_vm4, %v268_v48, 0.0 }
 0x1fb   :  { %v273_v51 = vpack.c.bf16 %v2029_v50, %v2025_v49 }
 0x1fd   :  { %301 = vrot.lane.b32.xlu2 %v273_v51, %s1877_s29 }
 0x257   :  { %v302_v52 = vpop.permute.xlu2 %301 }
 0x258   :  { %1565 = vmatmul.msk.bf16.vlgmr.msra.gmra.mxu2 %vm207_vm5, %v302_v52  ;;  %1566 = vmatmul.msk.bf16.vlgmr.msra.gmra.mxu3 %vm207_vm5, %v302_v52 }
 0x259   :  { %775 = vmatpush.bf16.msra.mxu2 %v1992_v39  ;;  %795 = vmatpush.bf16.msra.mxu3 %v1994_v40 }
 0x25d   :  { %776 = vmatpush.bf16.msra.mxu2 %v1998_v41  ;;  %796 = vmatpush.bf16.msra.mxu3 %v2000_v42 }
 0x2db   :  { %v327_v57 = vpop.f32.mrf.mxu2  ;;  %v394_v58 = vpop.f32.mrf.mxu3 }
 0x2dc   :  { %v328_v59 = vadd.f32 %v327_v57, %v295_v54  ;;  %v399_v60 = vadd.f32 %v1599_v55, %v394_v58 }
 0x2de   :  { %v332_v61 = vadd.f32 %v2043_v56, %v328_v59  ;;  %v401_v62 = vmul.f32 %v399_v60, %v1956_v8 }
 0x2e0   :  { %v334_v63 = vmul.f32 %v332_v61, %v1956_v8  ;;  %1649 = vtanh.f32 %v401_v62 }
 0x2e2   :  { %1651 = vtanh.f32 %v334_v63  ;;  %v109_v63 = vsel %vm107_vm6, 1, %v1881_v0 }
 0x2e3   :  { %v329_v5 = vpop.f32.mrf.mxu2  ;;  %v396_v6 = vpop.f32.mrf.mxu3 }
 0x2e4   :  { %v330_v7 = vadd.f32 %v329_v5, %v297_v4  ;;  %v400_v9 = vadd.f32 %v1600_v3, %v396_v6 }
 0x2e6   :  { %v1650_v10 = vpop.eup %1649  ;;  %v333_v11 = vadd.f32 %v2043_v56, %v330_v7  ;;  %v402_v12 = vmul.f32 %v400_v9, %v1956_v8 }
 0x2e7   :  { %v405_v13 = vmul.f32 %v1650_v10, %v1956_v8 }
 0x2e8   :  { %v1652_v14 = vpop.eup %1651  ;;  %v335_v15 = vmul.f32 %v333_v11, %v1956_v8  ;;  %1653 = vtanh.f32 %v402_v12 }
 0x2e9   :  { %v2053_v16 = vadd.f32 %v405_v13, %v1960_v17  ;;  %v338_v18 = vmul.f32 %v1652_v14, %v1956_v8 }
 0x2ea   :  { %1655 = vtanh.f32 %v335_v15 }
 0x2eb   :  { %413 = vrot.lane.b32.xlu0 %v2053_v16, %s1883_s15  ;;  %v340_v19 = vadd.f32 %v338_v18, %v1960_v17  ;;  %v409_v60 = vmul.f32 %v2053_v16, %v2092_v37 }
 0x2ed   :  { %346 = vrot.lane.b32.xlu1 %v340_v19, %s1883_s15  ;;  %v342_v38 = vmul.f32 0.0, %v340_v19 }
 0x2ee   :  { %v1654_v20 = vpop.eup %1653 }
 0x2ef   :  { %v406_v21 = vmul.f32 %v1654_v20, %v1956_v8 }
 0x2f0   :  { %v1656_v22 = vpop.eup %1655 }
 0x2f1   :  { %v339_v24 = vmul.f32 %v1656_v22, %v1956_v8  ;;  %v408_v26 = vadd.f32 %v406_v21, %v1960_v17 }
 0x2f3   :  { %v341_v25 = vadd.f32 %v339_v24, %v1960_v17  ;;  %v410_v51 = vmul.f32 %v408_v26, %v2077_v47 }
 0x2f5   :  { %348 = vrot.lane.b32.xlu2 %v341_v25, %s1883_s15  ;;  %415 = vrot.lane.b32.xlu1 %v408_v26, %s1883_s15  ;;  %v343_v48 = vmul.f32 0.0, %v341_v25 }
 0x34f   :  { %v349_v27 = vpop.permute.xlu2 %348 }
 0x350   :  { %v353_v28 = vmul.f32 %v349_v27, %v341_v25 }
 0x352   :  { %358 = vrot.lane.b32.xlu0 %v353_v28, %s1883_s15 }
 0x35d   :  { %v414_v30 = vpop.permute.xlu0 %413 }
 0x35e   :  { %v419_v31 = vmul.f32 %v414_v30, %v2053_v16 }
 0x35f   :  { %v347_v32 = vpop.permute.xlu1 %346 }
 0x360   :  { %v352_v34 = vmul.f32 %v347_v32, %v340_v19  ;;  %423 = vrot.lane.b32.xlu1 %v419_v31, %s1883_s15 }
 0x362   :  { %356 = vrot.lane.b32.xlu2 %v352_v34, %s1883_s15 }
 0x367   :  { %v416_v35 = vpop.permute.xlu1 %415 }
 0x368   :  { %v420_v36 = vmul.f32 %v416_v35, %v408_v26 }
 0x36a   :  { %425 = vrot.lane.b32.xlu2 %v420_v36, %s1883_s15 }
 0x3bc   :  { %v357_v43 = vpop.permute.xlu2 %356 }
 0x3bd   :  { %v2071_v46 = vadd.f32 %v357_v43, %v342_v38 }
 0x3bf   :  { %1657 = vtanh.f32 %v2071_v46 }
 0x3c4   :  { %v359_v52 = vpop.permute.xlu0 %358  ;;  %v426_v53 = vpop.permute.xlu2 %425 }
 0x3c5   :  { %v1658_v54 = vpop.eup %1657  ;;  %v2080_v55 = vadd.f32 %v359_v52, %v343_v48  ;;  %v2082_v57 = vadd.f32 %v426_v53, %v410_v51 }
 0x3c6   :  { %368 = vrot.lane.b32.xlu0 %v1658_v54, %s1883_s15 }
 0x3c7   :  { %1659 = vtanh.f32 %v2080_v55 }
 0x3c8   :  { %1661 = vtanh.f32 %v2082_v57 }
 0x3cd   :  { %v1660_v58 = vpop.eup %1659 }
 0x3ce   :  { %v1662_v59 = vpop.eup %1661  ;;  %370 = vrot.lane.b32.xlu1 %v1660_v58, %s1883_s15 }
 0x3cf   :  { %437 = vrot.lane.b32.xlu0 %v1662_v59, %s1883_s15 }
 0x3d2   :  { %v424_v61 = vpop.permute.xlu1 %423 }
 0x3d3   :  { %v2097_v62 = vadd.f32 %v424_v61, %v409_v60 }
 0x3d5   :  { %1663 = vtanh.f32 %v2097_v62 }
 0x3d6   :  { %112 = vperm.xlu1 %1638, %v109_v63  }
 0x3db   :  { %v1664_v3 = vpop.eup %1663 }
 0x3dc   :  { %435 = vrot.lane.b32.xlu2 %v1664_v3, %s1883_s15 }
 0x3e4   :  { %115 = vperm.xlu2 %1639, %v110_v33  }
 0x436   :  { %v436_v5 = vpop.permute.xlu2 %435 }
 0x437   :  { %v441_v18 = vmul.f32 %v436_v5, %v2053_v16 }
 0x438   :  { %v369_v4 = vpop.permute.xlu0 %368 }
 0x439   :  { %v374_v6 = vmul.f32 %v369_v4, %v340_v19 }
 0x43b   :  { %v2106_v11 = vsel %vm105_vm3, %v374_v6, 0.0 }
 0x43e   :  { %v2114_v14 = vpop.permute.xlu2 %115 }
 0x43f   :  { %vm118_vm8 = vcmp.eq.s32.totalorder %v2114_v14, 1 }
 0x440   :  { %v371_v7 = vpop.permute.xlu1 %370 }
 0x441   :  { %v375_v9 = vmul.f32 %v371_v7, %v341_v25  ;;  %v438_v10 = vpop.permute.xlu0 %437  ;;  %v1602_v25 = vld [vmem:[#allocation2 + $0x10] sm:$0xff]  }
 0x442   :  { %v442_v15 = vmul.f32 %v438_v10, %v408_v26  ;;  %v1603_v28 = vunpack.c.l.bf16 %v1602_v25  ;;  %v1604_v48 = vunpack.c.h.bf16 %v1602_v25 }
 0x443   :  { %v2110_v12 = vsel %vm106_vm4, %v375_v9, 0.0 }
 0x444   :  { %v448_v13 = vpack.c.bf16 %v2110_v12, %v2106_v11  ;;  %v2130_v21 = vsel %vm118_vm8, %v442_v15, %v2029_v50 }
 0x446   :  { %450 = vrot.lane.b32.xlu0 %v448_v13, %s1877_s29 }
 0x448   :  { %v2118_v19 = vpop.permute.xlu1 %112 }
 0x449   :  { %vm117_vm9 = vcmp.eq.s32.totalorder %v2118_v19, 1 }
 0x44a   :  { %v2125_v20 = vsel %vm117_vm9, %v441_v18, %v2025_v49 }
 0x44b   :  { %v447_v22 = vpack.c.bf16 %v2130_v21, %v2125_v20 }
 0x44d   :  { %470 = vrot.lane.b32.xlu1 %v447_v22, %s1877_s29 }
 0x4b8   :  { %v451_v16 = vpop.permute.xlu0 %450 }
 0x4b9   :  { %1567 = vmatmul.msk.bf16.vlgmr.msrb.gmra.mxu0 %vm207_vm5, %v451_v16 }
 0x4ba   :  { %862 = vmatpush.bf16.msrb.mxu0 %v1944_v1 }
 0x4be   :  { %863 = vmatpush.bf16.msrb.mxu0 %v1950_v2 }
 0x4bf   :  { %v471_v24 = vpop.permute.xlu1 %470 }
 0x4c0   :  { %1568 = vmatmul.msk.bf16.vlgmr.msrb.gmra.mxu1 %vm207_vm5, %v471_v24  ;;  %1569 = vmatmul.msk.bf16.vlgmr.msrb.gmra.mxu2 %vm207_vm5, %v471_v24 }
 0x4c1   :  { %952 = vmatpush.bf16.msrb.mxu2 %v1994_v40  ;;  %932 = vmatpush.bf16.msrb.mxu1 %v1992_v39 }
 0x4c5   :  { %953 = vmatpush.bf16.msrb.mxu2 %v2000_v42  ;;  %933 = vmatpush.bf16.msrb.mxu1 %v1998_v41 }
 0x536   :  { %v464_v49 = vpop.f32.mrf.mxu0 }
 0x53d   :  { %v484_v50 = vpop.f32.mrf.mxu1 }
 0x53e   :  { %v485_v26 = vadd.f32 %v484_v50, %v464_v49  ;;  %v466_v34 = vpop.f32.mrf.mxu0  ;;  %v2177_v50 = vsel %vm105_vm3, %v2071_v46, 0.0  ;;  %vm144_vm3 = vcmp.gt.s32.totalorder %v1979_v29, 4 }
 0x540   :  { %v489_v27 = vadd.f32 %v2043_v56, %v485_v26 }
 0x542   :  { %v491_v30 = vmul.f32 %v489_v27, %v1956_v8 }
 0x543   :  { %v551_v31 = vpop.f32.mrf.mxu2 }
 0x544   :  { %1665 = vtanh.f32 %v491_v30  ;;  %v556_v32 = vadd.f32 %v1603_v28, %v551_v31  ;;  %v2187_v28 = vsel %vm117_vm9, %v2097_v62, %v2092_v37 }
 0x545   :  { %v486_v35 = vpop.f32.mrf.mxu1 }
 0x546   :  { %v558_v36 = vmul.f32 %v556_v32, %v1956_v8  ;;  %v487_v38 = vadd.f32 %v486_v35, %v466_v34  ;;  %v2200_v32 = vsel %vm118_vm8, %v2082_v57, %v2077_v47  ;;  %v2213_v47 = vsel %vm106_vm4, %v2080_v55, 0.0 }
 0x548   :  { %1667 = vtanh.f32 %v558_v36  ;;  %v490_v43 = vadd.f32 %v2043_v56, %v487_v38  ;;  %v122_v36 = vsel %vm120_vm10, 1, %v1881_v0 }
 0x54a   :  { %v1666_v51 = vpop.eup %1665  ;;  %v492_v52 = vmul.f32 %v490_v43, %v1956_v8 }
 0x54b   :  { %v553_v53 = vpop.f32.mrf.mxu2  ;;  %v495_v54 = vmul.f32 %v1666_v51, %v1956_v8 }
 0x54c   :  { %1669 = vtanh.f32 %v492_v52  ;;  %v557_v58 = vadd.f32 %v1604_v48, %v553_v53  ;;  %v121_v52 = vsel %vm119_vm11, 1, %v1881_v0 }
 0x54d   :  { %v2151_v59 = vadd.f32 %v495_v54, %v1960_v17 }
 0x54e   :  { %v1668_v60 = vpop.eup %1667  ;;  %v559_v61 = vmul.f32 %v557_v58, %v1956_v8 }
 0x54f   :  { %503 = vrot.lane.b32.xlu2 %v2151_v59, %s1883_s15  ;;  %v562_v63 = vmul.f32 %v1668_v60, %v1956_v8  ;;  %v499_v25 = vmul.f32 %v2151_v59, %v2177_v50 }
 0x550   :  { %1671 = vtanh.f32 %v559_v61 }
 0x551   :  { %v2158_v3 = vadd.f32 %v562_v63, %v1960_v17 }
 0x552   :  { %v1670_v33 = vpop.eup %1669 }
 0x553   :  { %570 = vrot.lane.b32.xlu1 %v2158_v3, %s1883_s15  ;;  %v496_v4 = vmul.f32 %v1670_v33, %v1956_v8  ;;  %v566_v30 = vmul.f32 %v2158_v3, %v2187_v28 }
 0x555   :  { %v498_v5 = vadd.f32 %v496_v4, %v1960_v17 }
 0x556   :  { %v1672_v6 = vpop.eup %1671 }
 0x557   :  { %505 = vrot.lane.b32.xlu0 %v498_v5, %s1883_s15  ;;  %v563_v7 = vmul.f32 %v1672_v6, %v1956_v8  ;;  %v500_v57 = vmul.f32 %v498_v5, %v2213_v47 }
 0x559   :  { %v565_v9 = vadd.f32 %v563_v7, %v1960_v17 }
 0x55b   :  { %572 = vrot.lane.b32.xlu2 %v565_v9, %s1883_s15  ;;  %v567_v37 = vmul.f32 %v565_v9, %v2200_v32 }
 0x5a9   :  { %v504_v10 = vpop.permute.xlu2 %503 }
 0x5aa   :  { %v509_v13 = vmul.f32 %v504_v10, %v2151_v59 }
 0x5ac   :  { %513 = vrot.lane.b32.xlu0 %v509_v13, %s1883_s15 }
 0x5b5   :  { %v573_v15 = vpop.permute.xlu2 %572 }
 0x5b6   :  { %v577_v18 = vmul.f32 %v573_v15, %v565_v9 }
 0x5b8   :  { %582 = vrot.lane.b32.xlu0 %v577_v18, %s1883_s15 }
 0x5c5   :  { %v571_v22 = vpop.permute.xlu1 %570 }
 0x5c6   :  { %v576_v16 = vmul.f32 %v571_v22, %v2158_v3 }
 0x5c8   :  { %580 = vrot.lane.b32.xlu2 %v576_v16, %s1883_s15 }
 0x5c9   :  { %v506_v24 = vpop.permute.xlu0 %505 }
 0x5ca   :  { %v510_v49 = vmul.f32 %v506_v24, %v498_v5 }
 0x5cc   :  { %515 = vrot.lane.b32.xlu1 %v510_v49, %s1883_s15 }
 0x61e   :  { %v514_v26 = vpop.permute.xlu0 %513 }
 0x61f   :  { %v2181_v27 = vadd.f32 %v514_v26, %v499_v25 }
 0x621   :  { %1673 = vtanh.f32 %v2181_v27 }
 0x622   :  { %v581_v44 = vpop.permute.xlu2 %580 }
 0x623   :  { %v2192_v46 = vadd.f32 %v581_v44, %v566_v30 }
 0x625   :  { %1675 = vtanh.f32 %v2192_v46 }
 0x627   :  { %v1674_v31 = vpop.eup %1673 }
 0x628   :  { %525 = vrot.lane.b32.xlu1 %v1674_v31, %s1883_s15 }
 0x62a   :  { %v583_v62 = vpop.permute.xlu0 %582 }
 0x62b   :  { %v1676_v34 = vpop.eup %1675  ;;  %v2203_v35 = vadd.f32 %v583_v62, %v567_v37 }
 0x62c   :  { %592 = vrot.lane.b32.xlu0 %v1676_v34, %s1883_s15 }
 0x62d   :  { %1677 = vtanh.f32 %v2203_v35 }
 0x633   :  { %v1678_v38 = vpop.eup %1677 }
 0x634   :  { %127 = vperm.xlu0 %1637, %v122_v36   ;;  %594 = vrot.lane.b32.xlu1 %v1678_v38, %s1883_s15 }
 0x63e   :  { %v516_v43 = vpop.permute.xlu1 %515 }
 0x63f   :  { %v2216_v48 = vadd.f32 %v516_v43, %v500_v57 }
 0x641   :  { %1679 = vtanh.f32 %v2216_v48 }
 0x647   :  { %v1680_v51 = vpop.eup %1679 }
 0x648   :  { %527 = vrot.lane.b32.xlu2 %v1680_v51, %s1883_s15 }
 0x650   :  { %124 = vperm.xlu2 %1639, %v121_v52  }
 0x69a   :  { %v526_v53 = vpop.permute.xlu1 %525 }
 0x69b   :  { %v531_v45 = vmul.f32 %v526_v53, %v2151_v59 }
 0x69d   :  { %v2226_v60 = vsel %vm117_vm9, %v531_v45, %v2106_v11 }
 0x69e   :  { %v593_v54 = vpop.permute.xlu0 %592 }
 0x69f   :  { %v598_v59 = vmul.f32 %v593_v54, %v2158_v3 }
 0x6a2   :  { %v528_v55 = vpop.permute.xlu2 %527 }
 0x6a3   :  { %v532_v58 = vmul.f32 %v528_v55, %v498_v5 }
 0x6a5   :  { %v2231_v61 = vsel %vm118_vm8, %v532_v58, %v2110_v12 }
 0x6a6   :  { %v595_v63 = vpop.permute.xlu1 %594  ;;  %v2233_v33 = vpop.permute.xlu0 %127  ;;  %v605_v4 = vpack.c.bf16 %v2231_v61, %v2226_v60 }
 0x6a7   :  { %v599_v6 = vmul.f32 %v595_v63, %v565_v9  ;;  %vm130_vm12 = vcmp.eq.s32.totalorder %v2233_v33, 1 }
 0x6a8   :  { %607 = vrot.lane.b32.xlu1 %v605_v4, %s1877_s29 }
 0x6a9   :  { %v2251_v5 = vsel %vm130_vm12, %v599_v6, %v2130_v21  ;;  %v1606_v21 = vld [vmem:[#allocation2 + $0x18] sm:$0xff]  }
 0x6aa   :  { %v2240_v11 = vpop.permute.xlu2 %124  ;;  %v1607_v9 = vunpack.c.l.bf16 %v1606_v21  ;;  %v1608_v49 = vunpack.c.h.bf16 %v1606_v21 }
 0x6ab   :  { %vm129_vm13 = vcmp.eq.s32.totalorder %v2240_v11, 1 }
 0x6ac   :  { %v2246_v12 = vsel %vm129_vm13, %v598_v59, %v2125_v20 }
 0x6ad   :  { %v604_v7 = vpack.c.bf16 %v2251_v5, %v2246_v12 }
 0x6af   :  { %627 = vrot.lane.b32.xlu2 %v604_v7, %s1877_s29 }
 0x709   :  { %v628_v3 = vpop.permute.xlu2 %627 }
 0x70a   :  { %1571 = vmatmul.msk.bf16.vlgmr.msra.gmra.mxu0 %vm207_vm5, %v628_v3  ;;  %1572 = vmatmul.msk.bf16.vlgmr.msra.gmra.mxu1 %vm207_vm5, %v628_v3 }
 0x70b   :  { %1109 = vmatpush.bf16.msra.mxu1 %v1994_v40  ;;  %1089 = vmatpush.bf16.msra.mxu0 %v1992_v39 }
 0x70f   :  { %1110 = vmatpush.bf16.msra.mxu1 %v2000_v42  ;;  %1090 = vmatpush.bf16.msra.mxu0 %v1998_v41 }
 0x71a   :  { %v608_v20 = vpop.permute.xlu1 %607 }
 0x71b   :  { %1570 = vmatmul.msk.bf16.vlgmr.msrb.gmra.mxu3 %vm207_vm5, %v608_v20 }
 0x71c   :  { %1019 = vmatpush.bf16.msrb.mxu3 %v1944_v1 }
 0x720   :  { %1020 = vmatpush.bf16.msrb.mxu3 %v1950_v2 }
 0x787   :  { %v708_v10 = vpop.f32.mrf.mxu1  ;;  %v641_v24 = vpop.f32.mrf.mxu0 }
 0x788   :  { %v713_v13 = vadd.f32 %v1607_v9, %v708_v10 }
 0x78a   :  { %v715_v15 = vmul.f32 %v713_v13, %v1956_v8  ;;  %v2295_v13 = vsel %vm129_vm13, %v2192_v46, %v2187_v28  ;;  %v2309_v28 = vsel %vm118_vm8, %v2216_v48, %v2213_v47  ;;  %v133_v47 = vsel %vm131_vm15, 1, %v1881_v0 }
 0x78c   :  { %1681 = vtanh.f32 %v715_v15 }
 0x78f   :  { %v710_v25 = vpop.f32.mrf.mxu1  ;;  %v643_v34 = vpop.f32.mrf.mxu0 }
 0x790   :  { %v714_v44 = vadd.f32 %v1608_v49, %v710_v25  ;;  %v134_v49 = vsel %vm132_vm14, 1, %v1881_v0 }
 0x792   :  { %v1682_v18 = vpop.eup %1681  ;;  %v716_v62 = vmul.f32 %v714_v44, %v1956_v8  ;;  %v2321_v44 = vsel %vm117_vm9, %v2181_v27, %v2177_v50 }
 0x793   :  { %v719_v22 = vmul.f32 %v1682_v18, %v1956_v8 }
 0x795   :  { %v2268_v16 = vadd.f32 %v719_v22, %v1960_v17 }
 0x797   :  { %727 = vrot.lane.b32.xlu2 %v2268_v16, %s1883_s15  ;;  %v723_v15 = vmul.f32 %v2268_v16, %v2295_v13 }
 0x79e   :  { %v621_v26 = vpop.f32.mrf.mxu3 }
 0x79f   :  { %v642_v30 = vadd.f32 %v641_v24, %v621_v26 }
 0x7a1   :  { %v646_v31 = vadd.f32 %v2043_v56, %v642_v30 }
 0x7a3   :  { %v648_v37 = vmul.f32 %v646_v31, %v1956_v8 }
 0x7a5   :  { %1683 = vtanh.f32 %v648_v37  ;;  %v2332_v37 = vsel %vm130_vm12, %v2203_v35, %v2200_v32 }
 0x7a6   :  { %v623_v36 = vpop.f32.mrf.mxu3  ;;  %1685 = vtanh.f32 %v716_v62 }
 0x7a7   :  { %v644_v38 = vadd.f32 %v643_v34, %v623_v36 }
 0x7a9   :  { %v647_v57 = vadd.f32 %v2043_v56, %v644_v38 }
 0x7ab   :  { %v1684_v43 = vpop.eup %1683  ;;  %v649_v51 = vmul.f32 %v647_v57, %v1956_v8 }
 0x7ac   :  { %v652_v52 = vmul.f32 %v1684_v43, %v1956_v8  ;;  %v1686_v54 = vpop.eup %1685 }
 0x7ad   :  { %1687 = vtanh.f32 %v649_v51  ;;  %v720_v45 = vmul.f32 %v1686_v54, %v1956_v8 }
 0x7ae   :  { %v654_v53 = vadd.f32 %v652_v52, %v1960_v17 }
 0x7af   :  { %v722_v4 = vadd.f32 %v720_v45, %v1960_v17 }
 0x7b0   :  { %660 = vrot.lane.b32.xlu0 %v654_v53, %s1883_s15  ;;  %v656_v14 = vmul.f32 %v654_v53, %v2321_v44 }
 0x7b1   :  { %v724_v19 = vmul.f32 %v722_v4, %v2332_v37 }
 0x7b3   :  { %v1688_v55 = vpop.eup %1687 }
 0x7b4   :  { %v653_v58 = vmul.f32 %v1688_v55, %v1956_v8 }
 0x7b6   :  { %v655_v63 = vadd.f32 %v653_v58, %v1960_v17 }
 0x7b8   :  { %662 = vrot.lane.b32.xlu1 %v655_v63, %s1883_s15  ;;  %729 = vrot.lane.b32.xlu0 %v722_v4, %s1883_s15  ;;  %v657_v46 = vmul.f32 %v655_v63, %v2309_v28 }
 0x7f1   :  { %v728_v6 = vpop.permute.xlu2 %727 }
 0x7f2   :  { %v733_v59 = vmul.f32 %v728_v6, %v2268_v16 }
 0x7f4   :  { %737 = vrot.lane.b32.xlu0 %v733_v59, %s1883_s15 }
 0x822   :  { %v661_v7 = vpop.permute.xlu0 %660 }
 0x823   :  { %v666_v3 = vmul.f32 %v661_v7, %v654_v53 }
 0x825   :  { %670 = vrot.lane.b32.xlu1 %v666_v3, %s1883_s15 }
 0x82a   :  { %v663_v20 = vpop.permute.xlu1 %662  ;;  %v730_v21 = vpop.permute.xlu0 %729 }
 0x82b   :  { %v667_v9 = vmul.f32 %v663_v20, %v655_v63  ;;  %v734_v10 = vmul.f32 %v730_v21, %v722_v4 }
 0x82d   :  { %672 = vrot.lane.b32.xlu2 %v667_v9, %s1883_s15  ;;  %739 = vrot.lane.b32.xlu1 %v734_v10, %s1883_s15 }
 0x866   :  { %v738_v18 = vpop.permute.xlu0 %737 }
 0x867   :  { %v2299_v22 = vadd.f32 %v738_v18, %v723_v15 }
 0x869   :  { %1689 = vtanh.f32 %v2299_v22 }
 0x86f   :  { %v1690_v24 = vpop.eup %1689 }
 0x870   :  { %749 = vrot.lane.b32.xlu1 %v1690_v24, %s1883_s15 }
 0x878   :  { %139 = vperm.xlu1 %1638, %v134_v49  }
 0x887   :  { %v673_v25 = vpop.permute.xlu2 %672 }
 0x888   :  { %v2312_v26 = vadd.f32 %v673_v25, %v657_v46 }
 0x88a   :  { %1691 = vtanh.f32 %v2312_v26 }
 0x890   :  { %v1692_v30 = vpop.eup %1691 }
 0x891   :  { %684 = vrot.lane.b32.xlu0 %v1692_v30, %s1883_s15 }
 0x897   :  { %v671_v48 = vpop.permute.xlu1 %670 }
 0x898   :  { %v2325_v31 = vadd.f32 %v671_v48, %v656_v14 }
 0x899   :  { %136 = vperm.xlu0 %1637, %v133_v47  }
 0x89a   :  { %1693 = vtanh.f32 %v2325_v31  ;;  %v2454_v33 = vsel %vm129_vm13, %v2325_v31, %v2321_v44 }
 0x89f   :  { %v740_v50 = vpop.permute.xlu1 %739 }
 0x8a0   :  { %v1694_v27 = vpop.eup %1693  ;;  %v2335_v62 = vadd.f32 %v740_v50, %v724_v19 }
 0x8a1   :  { %682 = vrot.lane.b32.xlu2 %v1694_v27, %s1883_s15 }
 0x8a2   :  { %1695 = vtanh.f32 %v2335_v62 }
 0x8a8   :  { %v1696_v34 = vpop.eup %1695 }
 0x8a9   :  { %751 = vrot.lane.b32.xlu2 %v1696_v34, %s1883_s15 }
 0x8e2   :  { %v750_v38 = vpop.permute.xlu1 %749 }
 0x8ea   :  { %v2352_v45 = vpop.permute.xlu1 %139 }
 0x8eb   :  { %vm142_vm0 = vcmp.eq.s32.totalorder %v2352_v45, 1 }
 0x8ec   :  { %v2429_v23 = vsel %vm142_vm0, %v2335_v62, %v2332_v37  ;;  %v146_v62 = vsel %vm144_vm3, 1, %v1881_v0  ;;  %vm1513_vm3 = vcmask 523264  }
 0x8fb   :  { %v683_v36 = vpop.permute.xlu2 %682 }
 0x8fc   :  { %v688_v57 = vmul.f32 %v683_v36, %v654_v53  ;;  %v755_v53 = vmul.f32 %v750_v38, %v2268_v16 }
 0x8fe   :  { %v2343_v35 = vsel %vm129_vm13, %v688_v57, %v2226_v60 }
 0x903   :  { %v685_v43 = vpop.permute.xlu0 %684  ;;  %v752_v32 = vpop.permute.xlu2 %751 }
 0x904   :  { %v689_v51 = vmul.f32 %v685_v43, %v655_v63  ;;  %v756_v55 = vmul.f32 %v752_v32, %v722_v4 }
 0x906   :  { %v2348_v52 = vsel %vm130_vm12, %v689_v51, %v2231_v61  ;;  %v2368_v61 = vsel %vm142_vm0, %v756_v55, %v2251_v5 }
 0x907   :  { %v762_v54 = vpack.c.bf16 %v2348_v52, %v2343_v35 }
 0x909   :  { %764 = vrot.lane.b32.xlu2 %v762_v54, %s1877_s29 }
 0x90b   :  { %v2356_v58 = vpop.permute.xlu0 %136 }
 0x90c   :  { %vm141_vm1 = vcmp.eq.s32.totalorder %v2356_v58, 1 }
 0x90d   :  { %v2363_v60 = vsel %vm141_vm1, %v755_v53, %v2246_v12  ;;  %v1610_v12 = vld [vmem:[#allocation2 + $0x20] sm:$0xff]  }
 0x90e   :  { %v761_v63 = vpack.c.bf16 %v2368_v61, %v2363_v60  ;;  %v1611_v5 = vunpack.c.l.bf16 %v1610_v12  ;;  %v1612_v7 = vunpack.c.h.bf16 %v1610_v12 }
 0x910   :  { %784 = vrot.lane.b32.xlu0 %v761_v63, %s1877_s29 }
 0x963   :  { %v765_v16 = vpop.permute.xlu2 %764 }
 0x964   :  { %1573 = vmatmul.msk.bf16.vlgmr.msra.gmra.mxu2 %vm207_vm5, %v765_v16 }
 0x965   :  { %1176 = vmatpush.bf16.msra.mxu2 %v1944_v1 }
 0x969   :  { %1177 = vmatpush.bf16.msra.mxu2 %v1950_v2 }
 0x982   :  { %v785_v4 = vpop.permute.xlu0 %784 }
 0x983   :  { %1574 = vmatmul.msk.bf16.vlgmr.msra.gmra.mxu3 %vm207_vm5, %v785_v4  ;;  %1575 = vmatmul.msk.bf16.vlgmr.msrb.gmra.mxu0 %vm207_vm5, %v785_v4 }
 0x984   :  { %1246 = vmatpush.bf16.msra.mxu3 %v1992_v39  ;;  %1266 = vmatpush.bf16.msrb.mxu0 %v1994_v40 }
 0x988   :  { %1247 = vmatpush.bf16.msra.mxu3 %v1998_v41  ;;  %1267 = vmatpush.bf16.msrb.mxu0 %v2000_v42 }
 0x9e7   :  { %v778_v2 = vpop.f32.mrf.mxu2 }
 0x9ef   :  { %v780_v46 = vpop.f32.mrf.mxu2 }
 0xa00   :  { %v865_v6 = vpop.f32.mrf.mxu0 }
 0xa01   :  { %v870_v59 = vadd.f32 %v1611_v5, %v865_v6  ;;  %v145_v5 = vsel %vm143_vm2, 1, %v1881_v0  ;;  %v2418_v6 = vsel %vm141_vm1, %v2299_v22, %v2295_v13  ;;  %v2441_v22 = vsel %vm130_vm12, %v2312_v26, %v2309_v28 }
 0xa03   :  { %v872_v1 = vmul.f32 %v870_v59, %v1956_v8 }
 0xa05   :  { %1697 = vtanh.f32 %v872_v1 }
 0xa06   :  { %v798_v3 = vpop.f32.mrf.mxu3 }
 0xa07   :  { %v799_v20 = vadd.f32 %v798_v3, %v778_v2 }
 0xa08   :  { %v867_v21 = vpop.f32.mrf.mxu0 }
 0xa09   :  { %v803_v9 = vadd.f32 %v2043_v56, %v799_v20  ;;  %v871_v10 = vadd.f32 %v1612_v7, %v867_v21 }
 0xa0b   :  { %v1698_v15 = vpop.eup %1697  ;;  %v805_v18 = vmul.f32 %v803_v9, %v1956_v8  ;;  %v873_v24 = vmul.f32 %v871_v10, %v1956_v8 }
 0xa0c   :  { %v876_v49 = vmul.f32 %v1698_v15, %v1956_v8 }
 0xa0d   :  { %1699 = vtanh.f32 %v805_v18 }
 0xa0e   :  { %1701 = vtanh.f32 %v873_v24  ;;  %v800_v25 = vpop.f32.mrf.mxu3  ;;  %v2388_v30 = vadd.f32 %v876_v49, %v1960_v17 }
 0xa0f   :  { %v801_v14 = vadd.f32 %v800_v25, %v780_v46 }
 0xa10   :  { %884 = vrot.lane.b32.xlu1 %v2388_v30, %s1883_s15  ;;  %v880_v59 = vmul.f32 %v2388_v30, %v2418_v6 }
 0xa11   :  { %v804_v47 = vadd.f32 %v2043_v56, %v801_v14 }
 0xa13   :  { %v1700_v48 = vpop.eup %1699  ;;  %v806_v19 = vmul.f32 %v804_v47, %v1956_v8 }
 0xa14   :  { %v1702_v50 = vpop.eup %1701  ;;  %v809_v27 = vmul.f32 %v1700_v48, %v1956_v8 }
 0xa15   :  { %1703 = vtanh.f32 %v806_v19  ;;  %v877_v34 = vmul.f32 %v1702_v50, %v1956_v8 }
 0xa16   :  { %v2397_v36 = vadd.f32 %v809_v27, %v1960_v17 }
 0xa17   :  { %v879_v38 = vadd.f32 %v877_v34, %v1960_v17 }
 0xa18   :  { %817 = vrot.lane.b32.xlu0 %v2397_v36, %s1883_s15  ;;  %v813_v28 = vmul.f32 %v2397_v36, %v2454_v33 }
 0xa19   :  { %886 = vrot.lane.b32.xlu2 %v879_v38, %s1883_s15  ;;  %v881_v7 = vmul.f32 %v879_v38, %v2429_v23 }
 0xa1b   :  { %v1704_v57 = vpop.eup %1703 }
 0xa1c   :  { %v810_v43 = vmul.f32 %v1704_v57, %v1956_v8 }
 0xa1e   :  { %v812_v51 = vadd.f32 %v810_v43, %v1960_v17 }
 0xa20   :  { %819 = vrot.lane.b32.xlu1 %v812_v51, %s1883_s15  ;;  %v814_v37 = vmul.f32 %v812_v51, %v2441_v22 }
 0xa73   :  { %v887_v32 = vpop.permute.xlu2 %886 }
 0xa74   :  { %v891_v54 = vmul.f32 %v887_v32, %v879_v38 }
 0xa76   :  { %896 = vrot.lane.b32.xlu0 %v891_v54, %s1883_s15 }
 0xa82   :  { %v885_v55 = vpop.permute.xlu1 %884 }
 0xa83   :  { %v890_v53 = vmul.f32 %v885_v55, %v2388_v30 }
 0xa85   :  { %894 = vrot.lane.b32.xlu2 %v890_v53, %s1883_s15 }
 0xa8a   :  { %v818_v63 = vpop.permute.xlu0 %817 }
 0xa8b   :  { %v823_v16 = vmul.f32 %v818_v63, %v2397_v36 }
 0xa8d   :  { %827 = vrot.lane.b32.xlu1 %v823_v16, %s1883_s15 }
 0xa92   :  { %v820_v4 = vpop.permute.xlu1 %819 }
 0xa93   :  { %v824_v12 = vmul.f32 %v820_v4, %v812_v51 }
 0xa95   :  { %829 = vrot.lane.b32.xlu2 %v824_v12, %s1883_s15 }
 0xa9d   :  { %148 = vperm.xlu2 %1639, %v145_v5  }
 0xadf   :  { %v895_v1 = vpop.permute.xlu2 %894 }
 0xae0   :  { %v2422_v2 = vadd.f32 %v895_v1, %v880_v59 }
 0xae2   :  { %1705 = vtanh.f32 %v2422_v2 }
 0xae8   :  { %v1706_v3 = vpop.eup %1705  ;;  %v897_v20 = vpop.permute.xlu0 %896 }
 0xae9   :  { %v2432_v13 = vadd.f32 %v897_v20, %v881_v7  ;;  %906 = vrot.lane.b32.xlu0 %v1706_v3, %s1883_s15 }
 0xaeb   :  { %1707 = vtanh.f32 %v2432_v13 }
 0xaef   :  { %v830_v21 = vpop.permute.xlu2 %829 }
 0xaf0   :  { %v2445_v9 = vadd.f32 %v830_v21, %v814_v37 }
 0xaf1   :  { %v1708_v10 = vpop.eup %1707  ;;  %151 = vperm.xlu0 %1637, %v146_v62  }
 0xaf2   :  { %1709 = vtanh.f32 %v2445_v9  ;;  %908 = vrot.lane.b32.xlu1 %v1708_v10, %s1883_s15 }
 0xaf7   :  { %v2462_v49 = vpop.permute.xlu2 %148 }
 0xaf8   :  { %v1710_v29 = vpop.eup %1709  ;;  %vm153_vm6 = vcmp.eq.s32.totalorder %v2462_v49, 1 }
 0xaf9   :  { %841 = vrot.lane.b32.xlu2 %v1710_v29, %s1883_s15 }
 0xaff   :  { %v828_v26 = vpop.permute.xlu1 %827 }
 0xb00   :  { %v2458_v15 = vadd.f32 %v828_v26, %v813_v28 }
 0xb02   :  { %1711 = vtanh.f32 %v2458_v15 }
 0xb08   :  { %v1712_v18 = vpop.eup %1711 }
 0xb09   :  { %839 = vrot.lane.b32.xlu1 %v1712_v18, %s1883_s15 }
 0xb53   :  { %v842_v47 = vpop.permute.xlu2 %841 }
 0xb54   :  { %v846_v48 = vmul.f32 %v842_v47, %v812_v51 }
 0xb5b   :  { %v907_v24 = vpop.permute.xlu0 %906 }
 0xb5c   :  { %v912_v46 = vmul.f32 %v907_v24, %v2388_v30 }
 0xb5e   :  { %v2472_v31 = vsel %vm153_vm6, %v912_v46, %v2363_v60 }
 0xb63   :  { %v2465_v25 = vpop.permute.xlu0 %151 }
 0xb64   :  { %v909_v11 = vpop.permute.xlu1 %908  ;;  %vm154_vm4 = vcmp.eq.s32.totalorder %v2465_v25, 1 }
 0xb65   :  { %v913_v44 = vmul.f32 %v909_v11, %v879_v38 }
 0xb67   :  { %v2477_v14 = vsel %vm154_vm4, %v913_v44, %v2368_v61  ;;  %v2491_v61 = vsel %vm142_vm0, %v846_v48, %v2348_v52  ;;  %v1769_v52 = vld [vmem:[%s2907_s2 + $0x8] sm:$0xff] }
 0xb68   :  { %v918_v30 = vpack.c.bf16 %v2477_v14, %v2472_v31 }
 0xb6a   :  { %941 = vrot.lane.b32.xlu0 %v918_v30, %s1877_s29 }
 0xb7b   :  { %v840_v19 = vpop.permute.xlu1 %839 }
 0xb7c   :  { %v845_v50 = vmul.f32 %v840_v19, %v2397_v36  ;;  %v1770_v36 = vld [vmem:[%s2907_s2] sm:$0xff] }
 0xb7e   :  { %v2486_v60 = vsel %vm141_vm1, %v845_v50, %v2343_v35  ;;  %v2539_v50 = vsel %vm153_vm6, %v2422_v2, %v2418_v6  ;;  %v2558_v2 = vsel %vm141_vm1, %v2458_v15, %v2454_v33 }
 0xb7f   :  { %v919_v27 = vpack.c.bf16 %v2491_v61, %v2486_v60 }
 0xb81   :  { %921 = vrot.lane.b32.xlu1 %v919_v27, %s1877_s29 }
 0xbdc   :  { %v942_v34 = vpop.permute.xlu0 %941 }
 0xbdd   :  { %1577 = vmatmul.msk.bf16.vlgmr.msrb.gmra.mxu2 %vm207_vm5, %v942_v34  ;;  %1578 = vmatmul.msk.bf16.vlgmr.msrb.gmra.mxu3 %vm207_vm5, %v942_v34 }
 0xbde   :  { %1403 = vmatpush.bf16.msrb.mxu2 %v1992_v39  ;;  %1423 = vmatpush.bf16.msrb.mxu3 %v1994_v40  ;;  %v1614_v39 = vld [vmem:[#allocation2 + $0x28] sm:$0xff]  }
 0xbdf   :  { %v1615_v38 = vunpack.c.l.bf16 %v1614_v39  ;;  %v1616_v54 = vunpack.c.h.bf16 %v1614_v39 }
 0xbe2   :  { %1404 = vmatpush.bf16.msrb.mxu2 %v1998_v41  ;;  %1424 = vmatpush.bf16.msrb.mxu3 %v2000_v42 }
 0xbf3   :  { %v922_v35 = vpop.permute.xlu1 %921 }
 0xbf4   :  { %1576 = vmatmul.msk.bf16.vlgmr.msrb.gmra.mxu1 %vm207_vm5, %v922_v35 }
 0xbf5   :  { %1333 = vmatpush.bf16.msrb.mxu1 %v1769_v52 }
 0xbf9   :  { %1334 = vmatpush.bf16.msrb.mxu1 %v1770_v36  ;;  %v2550_v36 = vld [vmem:[%s2906_s1 + $0x8] sm:$0xff] }
 0xbfa   :  { %vm156_vm7 = vcmp.gt.s32.totalorder %v2550_v36, 5  ;;  %vm168_vm11 = vcmp.gt.s32.totalorder %v2550_v36, 6 }
 0xbfb   :  { %v158_v6 = vsel %vm156_vm7, 1, %v1881_v0 }
 0xc60   :  { %v1022_v40 = vpop.f32.mrf.mxu3  ;;  %v955_v32 = vpop.f32.mrf.mxu2 }
 0xc61   :  { %v1027_v57 = vadd.f32 %v1615_v38, %v1022_v40 }
 0xc63   :  { %v1029_v41 = vmul.f32 %v1027_v57, %v1956_v8  ;;  %v2568_v57 = vsel %vm154_vm4, %v2432_v13, %v2429_v23 }
 0xc65   :  { %1713 = vtanh.f32 %v1029_v41 }
 0xc68   :  { %v1024_v55 = vpop.f32.mrf.mxu3  ;;  %v957_v59 = vpop.f32.mrf.mxu2 }
 0xc69   :  { %v1028_v16 = vadd.f32 %v1616_v54, %v1024_v55  ;;  %v2590_v55 = vld [vmem:[%s2906_s1] sm:$0xff] }
 0xc6a   :  { %vm155_vm8 = vcmp.gt.s32.totalorder %v2590_v55, 5  ;;  %vm167_vm12 = vcmp.gt.s32.totalorder %v2590_v55, 6  ;;  %vm179_vm15 = vcmp.gt.s32.totalorder %v2590_v55, 7 }
 0xc6b   :  { %v1714_v42 = vpop.eup %1713  ;;  %v1030_v5 = vmul.f32 %v1028_v16, %v1956_v8  ;;  %v157_v45 = vsel %vm155_vm8, 1, %v1881_v0 }
 0xc6c   :  { %v1033_v43 = vmul.f32 %v1714_v42, %v1956_v8 }
 0xc6e   :  { %v2512_v51 = vadd.f32 %v1033_v43, %v1960_v17  ;;  %v2580_v43 = vsel %vm142_vm0, %v2445_v9, %v2441_v22  ;;  %vm180_vm0 = vcmp.gt.s32.totalorder %v2550_v36, 7 }
 0xc70   :  { %1041 = vrot.lane.b32.xlu1 %v2512_v51, %s1883_s15  ;;  %v1037_v27 = vmul.f32 %v2512_v51, %v2539_v50 }
 0xc71   :  { %v935_v53 = vpop.f32.mrf.mxu1 }
 0xc72   :  { %v956_v63 = vadd.f32 %v955_v32, %v935_v53 }
 0xc74   :  { %v960_v4 = vadd.f32 %v2043_v56, %v956_v63 }
 0xc76   :  { %v962_v12 = vmul.f32 %v960_v4, %v1956_v8 }
 0xc78   :  { %1715 = vtanh.f32 %v962_v12 }
 0xc79   :  { %v937_v1 = vpop.f32.mrf.mxu1  ;;  %1717 = vtanh.f32 %v1030_v5 }
 0xc7a   :  { %v958_v7 = vadd.f32 %v957_v59, %v937_v1 }
 0xc7c   :  { %v961_v3 = vadd.f32 %v2043_v56, %v958_v7 }
 0xc7e   :  { %v1716_v20 = vpop.eup %1715  ;;  %v963_v37 = vmul.f32 %v961_v3, %v1956_v8 }
 0xc7f   :  { %v966_v62 = vmul.f32 %v1716_v20, %v1956_v8  ;;  %v1718_v10 = vpop.eup %1717 }
 0xc80   :  { %1719 = vtanh.f32 %v963_v37  ;;  %v1034_v29 = vmul.f32 %v1718_v10, %v1956_v8 }
 0xc81   :  { %v968_v21 = vadd.f32 %v966_v62, %v1960_v17 }
 0xc82   :  { %v1036_v18 = vadd.f32 %v1034_v29, %v1960_v17 }
 0xc83   :  { %974 = vrot.lane.b32.xlu2 %v968_v21, %s1883_s15  ;;  %v970_v39 = vmul.f32 %v968_v21, %v2558_v2 }
 0xc84   :  { %v1038_v41 = vmul.f32 %v1036_v18, %v2568_v57 }
 0xc86   :  { %v1720_v28 = vpop.eup %1719 }
 0xc87   :  { %v967_v26 = vmul.f32 %v1720_v28, %v1956_v8 }
 0xc89   :  { %v969_v56 = vadd.f32 %v967_v26, %v1960_v17 }
 0xc8b   :  { %1043 = vrot.lane.b32.xlu2 %v1036_v18, %s1883_s15  ;;  %976 = vrot.lane.b32.xlu0 %v969_v56, %s1883_s15  ;;  %v971_v23 = vmul.f32 %v969_v56, %v2580_v43 }
 0xcdd   :  { %v975_v24 = vpop.permute.xlu2 %974 }
 0xcde   :  { %v980_v46 = vmul.f32 %v975_v24, %v968_v21 }
 0xce0   :  { %984 = vrot.lane.b32.xlu0 %v980_v46, %s1883_s15 }
 0xce2   :  { %v1042_v11 = vpop.permute.xlu1 %1041 }
 0xce3   :  { %v1047_v44 = vmul.f32 %v1042_v11, %v2512_v51 }
 0xce5   :  { %1051 = vrot.lane.b32.xlu2 %v1047_v44, %s1883_s15  ;;  %v1044_v30 = vpop.permute.xlu2 %1043 }
 0xce6   :  { %v1048_v47 = vmul.f32 %v1044_v30, %v1036_v18  ;;  %v2635_v30 = vld [vmem:[%s2910_s5] ss:$0 sm:$0xff]  ;;  %s1884_s5 = smov 96  }
 0xce8   :  { %1053 = vrot.lane.b32.xlu0 %v1048_v47, %s1883_s15 }
 0xcfd   :  { %v977_v48 = vpop.permute.xlu0 %976 }
 0xcfe   :  { %v981_v19 = vmul.f32 %v977_v48, %v969_v56 }
 0xd00   :  { %986 = vrot.lane.b32.xlu1 %v981_v19, %s1883_s15 }
 0xd3f   :  { %v1052_v34 = vpop.permute.xlu2 %1051 }
 0xd40   :  { %v2543_v35 = vadd.f32 %v1052_v34, %v1037_v27 }
 0xd42   :  { %1721 = vtanh.f32 %v2543_v35 }
 0xd48   :  { %v1722_v52 = vpop.eup %1721 }
 0xd49   :  { %1063 = vrot.lane.b32.xlu0 %v1722_v52, %s1883_s15 }
 0xd51   :  { %163 = vperm.xlu0 %1637, %v158_v6  }
 0xd52   :  { %v985_v38 = vpop.permute.xlu0 %984 }
 0xd53   :  { %v2561_v40 = vadd.f32 %v985_v38, %v970_v39 }
 0xd55   :  { %1723 = vtanh.f32 %v2561_v40 }
 0xd5a   :  { %v1054_v42 = vpop.permute.xlu0 %1053 }
 0xd5b   :  { %v1724_v58 = vpop.eup %1723  ;;  %v2571_v33 = vadd.f32 %v1054_v42, %v1038_v41 }
 0xd5c   :  { %996 = vrot.lane.b32.xlu1 %v1724_v58, %s1883_s15 }
 0xd5d   :  { %1725 = vtanh.f32 %v2571_v33 }
 0xd63   :  { %v1726_v15 = vpop.eup %1725 }
 0xd64   :  { %1065 = vrot.lane.b32.xlu1 %v1726_v15, %s1883_s15 }
 0xd72   :  { %v987_v13 = vpop.permute.xlu1 %986 }
 0xd73   :  { %v2583_v32 = vadd.f32 %v987_v13, %v971_v23 }
 0xd75   :  { %1727 = vtanh.f32 %v2583_v32 }
 0xd7b   :  { %v1728_v54 = vpop.eup %1727 }
 0xd7c   :  { %998 = vrot.lane.b32.xlu2 %v1728_v54, %s1883_s15 }
 0xd84   :  { %160 = vperm.xlu2 %1639, %v157_v45  }
 0xdbb   :  { %v1064_v9 = vpop.permute.xlu0 %1063 }
 0xdbc   :  { %v1069_v3 = vmul.f32 %v1064_v9, %v2512_v51 }
 0xdc3   :  { %v2606_v1 = vpop.permute.xlu0 %163 }
 0xdc4   :  { %vm166_vm9 = vcmp.eq.s32.totalorder %v2606_v1, 1 }
 0xdce   :  { %v997_v22 = vpop.permute.xlu1 %996 }
 0xdcf   :  { %v1002_v53 = vmul.f32 %v997_v22, %v968_v21 }
 0xdd1   :  { %v2597_v12 = vsel %vm153_vm6, %v1002_v53, %v2486_v60 }
 0xdd6   :  { %v999_v63 = vpop.permute.xlu2 %998  ;;  %v1066_v4 = vpop.permute.xlu1 %1065 }
 0xdd7   :  { %v1003_v16 = vmul.f32 %v999_v63, %v969_v56  ;;  %v1070_v7 = vmul.f32 %v1066_v4, %v1036_v18 }
 0xdd9   :  { %v2602_v5 = vsel %vm154_vm4, %v1003_v16, %v2491_v61  ;;  %v2622_v61 = vsel %vm166_vm9, %v1070_v7, %v2477_v14 }
 0xdda   :  { %v1076_v59 = vpack.c.bf16 %v2602_v5, %v2597_v12 }
 0xddc   :  { %1078 = vrot.lane.b32.xlu1 %v1076_v59, %s1877_s29 }
 0xdde   :  { %v2610_v20 = vpop.permute.xlu2 %160 }
 0xddf   :  { %vm165_vm10 = vcmp.eq.s32.totalorder %v2610_v20, 1 }
 0xde0   :  { %v2617_v60 = vsel %vm165_vm10, %v1069_v3, %v2472_v31  ;;  %v1618_v31 = vld [vmem:[#allocation2 + $0x30] sm:$0xff]  }
 0xde1   :  { %v1075_v37 = vpack.c.bf16 %v2622_v61, %v2617_v60  ;;  %v1619_v21 = vunpack.c.l.bf16 %v1618_v31  ;;  %v1620_v26 = vunpack.c.h.bf16 %v1618_v31 }
 0xde3   :  { %1098 = vrot.lane.b32.xlu2 %v1075_v37, %s1877_s29  ;;  %v2665_v37 = vsel %vm165_vm10, %v2543_v35, %v2539_v50  ;;  %v2679_v50 = vsel %vm154_vm4, %v2583_v32, %v2580_v43  ;;  %v169_v43 = vsel %vm167_vm12, 1, %v1881_v0  ;;  %vm1516_vm4 = vcmask 785408  }
 0xe3d   :  { %v1099_v51 = vpop.permute.xlu2 %1098 }
 0xe3e   :  { %1580 = vmatmul.msk.bf16.vlgmr.msra.gmra.mxu1 %vm207_vm5, %v1099_v51  ;;  %1581 = vmatmul.msk.bf16.vlgmr.msra.gmra.mxu2 %vm207_vm5, %v1099_v51 }
 0xe4e   :  { %v1079_v62 = vpop.permute.xlu1 %1078 }
 0xe4f   :  { %1579 = vmatmul.msk.bf16.vlgmr.msra.gmra.mxu0 %vm207_vm5, %v1079_v62 }
 0xebb   :  { %v1112_v28 = vpop.f32.mrf.mxu1 }
 0xec1   :  { %v1179_v10 = vpop.f32.mrf.mxu2 }
 0xec2   :  { %v1184_v29 = vadd.f32 %v1619_v21, %v1179_v10  ;;  %v170_v10 = vsel %vm168_vm11, 1, %v1881_v0 }
 0xec3   :  { %v1114_v34 = vpop.f32.mrf.mxu1 }
 0xec4   :  { %v1186_v14 = vmul.f32 %v1184_v29, %v1956_v8 }
 0xec6   :  { %1729 = vtanh.f32 %v1186_v14 }
 0xec9   :  { %v1181_v56 = vpop.f32.mrf.mxu2 }
 0xeca   :  { %v1185_v44 = vadd.f32 %v1620_v26, %v1181_v56  ;;  %v2691_v26 = vsel %vm153_vm6, %v2561_v40, %v2558_v2  ;;  %v2702_v56 = vsel %vm166_vm9, %v2571_v33, %v2568_v57 }
 0xecc   :  { %v1730_v18 = vpop.eup %1729  ;;  %v1092_v24 = vpop.f32.mrf.mxu0  ;;  %v1187_v27 = vmul.f32 %v1185_v44, %v1956_v8 }
 0xecd   :  { %v1113_v46 = vadd.f32 %v1112_v28, %v1092_v24  ;;  %v1190_v11 = vmul.f32 %v1730_v18, %v1956_v8 }
 0xecf   :  { %v1117_v47 = vadd.f32 %v2635_v30, %v1113_v46  ;;  %v2639_v48 = vadd.f32 %v1190_v11, %v1960_v17 }
 0xed1   :  { %v1119_v19 = vmul.f32 %v1117_v47, %v1956_v8  ;;  %1198 = vrot.lane.b32.xlu2 %v2639_v48, %s1883_s15  ;;  %v1194_v51 = vmul.f32 %v2639_v48, %v2665_v37 }
 0xed3   :  { %1731 = vtanh.f32 %v1119_v19 }
 0xed4   :  { %v1094_v52 = vpop.f32.mrf.mxu0  ;;  %1733 = vtanh.f32 %v1187_v27 }
 0xed5   :  { %v1115_v6 = vadd.f32 %v1114_v34, %v1094_v52 }
 0xed7   :  { %v1118_v39 = vadd.f32 %v2635_v30, %v1115_v6 }
 0xed9   :  { %v1732_v38 = vpop.eup %1731  ;;  %v1120_v41 = vmul.f32 %v1118_v39, %v1956_v8 }
 0xeda   :  { %v1123_v42 = vmul.f32 %v1732_v38, %v1956_v8  ;;  %v1734_v15 = vpop.eup %1733 }
 0xedb   :  { %1735 = vtanh.f32 %v1120_v41  ;;  %v1191_v23 = vmul.f32 %v1734_v15, %v1956_v8 }
 0xedc   :  { %v1125_v58 = vadd.f32 %v1123_v42, %v1960_v17 }
 0xedd   :  { %v1193_v45 = vadd.f32 %v1191_v23, %v1960_v17 }
 0xede   :  { %1131 = vrot.lane.b32.xlu0 %v1125_v58, %s1883_s15  ;;  %v1127_v25 = vmul.f32 %v1125_v58, %v2691_v26 }
 0xedf   :  { %v1195_v49 = vmul.f32 %v1193_v45, %v2702_v56 }
 0xee1   :  { %v1736_v13 = vpop.eup %1735 }
 0xee2   :  { %v1124_v54 = vmul.f32 %v1736_v13, %v1956_v8 }
 0xee4   :  { %v1126_v22 = vadd.f32 %v1124_v54, %v1960_v17 }
 0xee6   :  { %1200 = vrot.lane.b32.xlu0 %v1193_v45, %s1883_s15  ;;  %1133 = vrot.lane.b32.xlu1 %v1126_v22, %s1883_s15  ;;  %v1128_v35 = vmul.f32 %v1126_v22, %v2679_v50 }
 0xf2b   :  { %v1199_v9 = vpop.permute.xlu2 %1198 }
 0xf2c   :  { %v1204_v53 = vmul.f32 %v1199_v9, %v2639_v48 }
 0xf2e   :  { %1208 = vrot.lane.b32.xlu0 %v1204_v53, %s1883_s15 }
 0xf50   :  { %v1132_v63 = vpop.permute.xlu0 %1131 }
 0xf51   :  { %v1137_v16 = vmul.f32 %v1132_v63, %v1125_v58 }
 0xf53   :  { %1141 = vrot.lane.b32.xlu1 %v1137_v16, %s1883_s15 }
 0xf58   :  { %v1201_v4 = vpop.permute.xlu0 %1200  ;;  %v1134_v59 = vpop.permute.xlu1 %1133 }
 0xf59   :  { %v1205_v7 = vmul.f32 %v1201_v4, %v1193_v45  ;;  %v1138_v3 = vmul.f32 %v1134_v59, %v1126_v22 }
 0xf5b   :  { %1210 = vrot.lane.b32.xlu1 %v1205_v7, %s1883_s15  ;;  %1143 = vrot.lane.b32.xlu2 %v1138_v3, %s1883_s15 }
 0xfa0   :  { %v1209_v62 = vpop.permute.xlu0 %1208 }
 0xfa1   :  { %v2669_v31 = vadd.f32 %v1209_v62, %v1194_v51 }
 0xfa3   :  { %1737 = vtanh.f32 %v2669_v31 }
 0xfa9   :  { %v1738_v21 = vpop.eup %1737 }
 0xfaa   :  { %1220 = vrot.lane.b32.xlu1 %v1738_v21, %s1883_s15 }
 0xfb2   :  { %175 = vperm.xlu1 %1638, %v170_v10  }
 0xfb5   :  { %v1144_v29 = vpop.permute.xlu2 %1143 }
 0xfb6   :  { %v2682_v14 = vadd.f32 %v1144_v29, %v1128_v35 }
 0xfb8   :  { %1739 = vtanh.f32 %v2682_v14 }
 0xfbe   :  { %v1740_v28 = vpop.eup %1739 }
 0xfbf   :  { %1155 = vrot.lane.b32.xlu0 %v1740_v28, %s1883_s15 }
 0xfc5   :  { %v1142_v32 = vpop.permute.xlu1 %1141 }
 0xfc6   :  { %v2695_v18 = vadd.f32 %v1142_v32, %v1127_v25 }
 0xfc7   :  { %172 = vperm.xlu0 %1637, %v169_v43  }
 0xfc8   :  { %1741 = vtanh.f32 %v2695_v18 }
 0xfcd   :  { %v1211_v2 = vpop.permute.xlu1 %1210 }
 0xfce   :  { %v1742_v40 = vpop.eup %1741  ;;  %v2705_v24 = vadd.f32 %v1211_v2, %v1195_v49 }
 0xfcf   :  { %1153 = vrot.lane.b32.xlu2 %v1742_v40, %s1883_s15 }
 0xfd0   :  { %1743 = vtanh.f32 %v2705_v24 }
 0xfd6   :  { %v1744_v46 = vpop.eup %1743 }
 0xfd7   :  { %1222 = vrot.lane.b32.xlu2 %v1744_v46, %s1883_s15 }
0x101c   :  { %v1221_v44 = vpop.permute.xlu1 %1220 }
0x101d   :  { %v1226_v38 = vmul.f32 %v1221_v44, %v2639_v48 }
0x1024   :  { %v2722_v6 = vpop.permute.xlu1 %175 }
0x1025   :  { %vm178_vm13 = vcmp.eq.s32.totalorder %v2722_v6, 1 }
0x1026   :  { %v2792_v20 = vsel %vm178_vm13, %v2705_v24, %v2702_v56 }
0x1029   :  { %v1154_v11 = vpop.permute.xlu2 %1153 }
0x102a   :  { %v1159_v47 = vmul.f32 %v1154_v11, %v1125_v58 }
0x102c   :  { %v2713_v33 = vsel %vm165_vm10, %v1159_v47, %v2597_v12 }
0x1031   :  { %v1156_v19 = vpop.permute.xlu0 %1155  ;;  %v1223_v57 = vpop.permute.xlu2 %1222 }
0x1032   :  { %v1160_v27 = vmul.f32 %v1156_v19, %v1126_v22  ;;  %v1227_v39 = vmul.f32 %v1223_v57, %v1193_v45 }
0x1034   :  { %v2718_v34 = vsel %vm166_vm9, %v1160_v27, %v2602_v5  ;;  %v2738_v5 = vsel %vm178_vm13, %v1227_v39, %v2622_v61 }
0x1035   :  { %v1233_v52 = vpack.c.bf16 %v2718_v34, %v2713_v33 }
0x1037   :  { %1235 = vrot.lane.b32.xlu2 %v1233_v52, %s1877_s29 }
0x1039   :  { %v2726_v41 = vpop.permute.xlu0 %172 }
0x103a   :  { %vm177_vm14 = vcmp.eq.s32.totalorder %v2726_v41, 1 }
0x103b   :  { %v2733_v12 = vsel %vm177_vm14, %v1226_v38, %v2617_v60  ;;  %v1622_v60 = vld [vmem:[#allocation2 + $0x38] sm:$0xff]  }
0x103c   :  { %v1232_v42 = vpack.c.bf16 %v2738_v5, %v2733_v12  ;;  %v1623_v23 = vunpack.c.l.bf16 %v1622_v60  ;;  %v1624_v63 = vunpack.c.h.bf16 %v1622_v60 }
0x103e   :  { %1255 = vrot.lane.b32.xlu0 %v1232_v42, %s1877_s29  ;;  %v2776_v42 = vsel %vm165_vm10, %v2695_v18, %v2691_v26 }
0x1091   :  { %v1236_v48 = vpop.permute.xlu2 %1235 }
0x1092   :  { %1582 = vmatmul.msk.bf16.vlgmr.msra.gmra.mxu3 %vm207_vm5, %v1236_v48 }
0x10b0   :  { %v1256_v58 = vpop.permute.xlu0 %1255 }
0x10b1   :  { %1583 = vmatmul.msk.bf16.vlgmr.msrb.gmra.mxu0 %vm207_vm5, %v1256_v58  ;;  %1584 = vmatmul.msk.bf16.vlgmr.msrb.gmra.mxu1 %vm207_vm5, %v1256_v58 }
0x1115   :  { %v1249_v15 = vpop.f32.mrf.mxu3 }
0x111d   :  { %v1251_v16 = vpop.f32.mrf.mxu3 }
0x112e   :  { %v1269_v13 = vpop.f32.mrf.mxu0  ;;  %v1336_v54 = vpop.f32.mrf.mxu1 }
0x112f   :  { %v1270_v61 = vadd.f32 %v1269_v13, %v1249_v15  ;;  %v1341_v45 = vadd.f32 %v1623_v23, %v1336_v54  ;;  %v2786_v15 = vsel %vm166_vm9, %v2682_v14, %v2679_v50  ;;  %v2809_v14 = vsel %vm177_vm14, %v2669_v31, %v2665_v37 }
0x1130   :  { %v182_v37 = vsel %vm180_vm0, 1, %v1881_v0 }
0x1131   :  { %v1274_v22 = vadd.f32 %v2635_v30, %v1270_v61  ;;  %v1343_v9 = vmul.f32 %v1341_v45, %v1956_v8 }
0x1133   :  { %v1276_v53 = vmul.f32 %v1274_v22, %v1956_v8  ;;  %1745 = vtanh.f32 %v1343_v9  ;;  %v181_v9 = vsel %vm179_vm15, 1, %v1881_v0 }
0x1135   :  { %1747 = vtanh.f32 %v1276_v53 }
0x1136   :  { %v1271_v4 = vpop.f32.mrf.mxu0  ;;  %v1338_v59 = vpop.f32.mrf.mxu1 }
0x1137   :  { %v1272_v7 = vadd.f32 %v1271_v4, %v1251_v16  ;;  %v1342_v3 = vadd.f32 %v1624_v63, %v1338_v59 }
0x1139   :  { %v1746_v51 = vpop.eup %1745  ;;  %v1275_v62 = vadd.f32 %v2635_v30, %v1272_v7  ;;  %v1344_v21 = vmul.f32 %v1342_v3, %v1956_v8 }
0x113a   :  { %v1347_v10 = vmul.f32 %v1746_v51, %v1956_v8 }
0x113b   :  { %v1748_v35 = vpop.eup %1747  ;;  %v1277_v29 = vmul.f32 %v1275_v62, %v1956_v8  ;;  %1749 = vtanh.f32 %v1344_v21 }
0x113c   :  { %v2754_v28 = vadd.f32 %v1347_v10, %v1960_v17  ;;  %v1280_v25 = vmul.f32 %v1748_v35, %v1956_v8 }
0x113d   :  { %1751 = vtanh.f32 %v1277_v29 }
0x113e   :  { %1355 = vrot.lane.b32.xlu0 %v2754_v28, %s1883_s15  ;;  %v1282_v43 = vadd.f32 %v1280_v25, %v1960_v17  ;;  %v1351_v56 = vmul.f32 %v2754_v28, %v2809_v14 }
0x1140   :  { %1288 = vrot.lane.b32.xlu1 %v1282_v43, %s1883_s15  ;;  %v1284_v48 = vmul.f32 %v1282_v43, %v2776_v42 }
0x1141   :  { %v1750_v32 = vpop.eup %1749 }
0x1142   :  { %v1348_v49 = vmul.f32 %v1750_v32, %v1956_v8 }
0x1143   :  { %v1752_v2 = vpop.eup %1751 }
0x1144   :  { %v1281_v40 = vmul.f32 %v1752_v2, %v1956_v8  ;;  %v1350_v11 = vadd.f32 %v1348_v49, %v1960_v17 }
0x1146   :  { %v1283_v46 = vadd.f32 %v1281_v40, %v1960_v17  ;;  %v1352_v18 = vmul.f32 %v1350_v11, %v2792_v20 }
0x1148   :  { %1290 = vrot.lane.b32.xlu2 %v1283_v46, %s1883_s15  ;;  %1357 = vrot.lane.b32.xlu1 %v1350_v11, %s1883_s15  ;;  %v1285_v26 = vmul.f32 %v1283_v46, %v2786_v15 }
0x11a2   :  { %v1291_v44 = vpop.permute.xlu2 %1290 }
0x11a3   :  { %v1295_v47 = vmul.f32 %v1291_v44, %v1283_v46 }
0x11a5   :  { %1300 = vrot.lane.b32.xlu0 %v1295_v47, %s1883_s15 }
0x11b0   :  { %v1356_v19 = vpop.permute.xlu0 %1355 }
0x11b1   :  { %v1361_v27 = vmul.f32 %v1356_v19, %v2754_v28 }
0x11b2   :  { %v1289_v57 = vpop.permute.xlu1 %1288 }
0x11b3   :  { %v1294_v52 = vmul.f32 %v1289_v57, %v1282_v43  ;;  %1365 = vrot.lane.b32.xlu1 %v1361_v27, %s1883_s15 }
0x11b5   :  { %1298 = vrot.lane.b32.xlu2 %v1294_v52, %s1883_s15 }
0x11ba   :  { %v1358_v39 = vpop.permute.xlu1 %1357 }
0x11bb   :  { %v1362_v38 = vmul.f32 %v1358_v39, %v1350_v11 }
0x11bd   :  { %1367 = vrot.lane.b32.xlu2 %v1362_v38, %s1883_s15 }
0x120f   :  { %v1299_v58 = vpop.permute.xlu2 %1298 }
0x1210   :  { %v2779_v60 = vadd.f32 %v1299_v58, %v1284_v48 }
0x1212   :  { %1753 = vtanh.f32 %v2779_v60  ;;  %v1320_v48 = vsel %vm177_vm14, %v2779_v60, %v2776_v42 }
0x1217   :  { %v1301_v23 = vpop.permute.xlu0 %1300  ;;  %v1368_v13 = vpop.permute.xlu2 %1367 }
0x1218   :  { %v1754_v54 = vpop.eup %1753  ;;  %v2796_v61 = vadd.f32 %v1301_v23, %v1285_v26  ;;  %v2798_v45 = vadd.f32 %v1368_v13, %v1352_v18 }
0x1219   :  { %1310 = vrot.lane.b32.xlu0 %v1754_v54, %s1883_s15 }
0x121a   :  { %1755 = vtanh.f32 %v2796_v61  ;;  %v1321_v26 = vsel %vm178_vm13, %v2796_v61, %v2786_v15 }
0x121b   :  { %1757 = vtanh.f32 %v2798_v45 }
0x1220   :  { %v1756_v1 = vpop.eup %1755 }
0x1221   :  { %v1758_v50 = vpop.eup %1757  ;;  %1312 = vrot.lane.b32.xlu1 %v1756_v1, %s1883_s15 }
0x1222   :  { %1379 = vrot.lane.b32.xlu0 %v1758_v50, %s1883_s15 }
0x1225   :  { %v1366_v24 = vpop.permute.xlu1 %1365 }
0x1226   :  { %v2814_v22 = vadd.f32 %v1366_v24, %v1351_v56 }
0x1228   :  { %1759 = vtanh.f32 %v2814_v22 }
0x1229   :  { %184 = vperm.xlu1 %1638, %v181_v9  }
0x122e   :  { %v1760_v53 = vpop.eup %1759 }
0x122f   :  { %1377 = vrot.lane.b32.xlu2 %v1760_v53, %s1883_s15 }
0x1237   :  { %187 = vperm.xlu2 %1639, %v182_v37  }
0x1289   :  { %v1378_v31 = vpop.permute.xlu2 %1377 }
0x128a   :  { %v1383_v62 = vmul.f32 %v1378_v31, %v2754_v28 }
0x128b   :  { %v1311_v55 = vpop.permute.xlu0 %1310 }
0x128c   :  { %v1316_v63 = vmul.f32 %v1311_v55, %v1282_v43 }
0x128e   :  { %v2824_v7 = vsel %vm177_vm14, %v1316_v63, %v2713_v33 }
0x1291   :  { %v2833_v36 = vpop.permute.xlu2 %187 }
0x1292   :  { %vm190_vm1 = vcmp.eq.s32.totalorder %v2833_v36, 1 }
0x1293   :  { %v1313_v16 = vpop.permute.xlu1 %1312 }
0x1294   :  { %v1317_v4 = vmul.f32 %v1313_v16, %v1283_v46  ;;  %v1380_v59 = vpop.permute.xlu0 %1379 }
0x1295   :  { %v1384_v51 = vmul.f32 %v1380_v59, %v1350_v11 }
0x1296   :  { %v2829_v3 = vsel %vm178_vm13, %v1317_v4, %v2718_v34 }
0x1297   :  { %v1390_v0 = vpack.c.bf16 %v2829_v3, %v2824_v7  ;;  %v1386_v34 = vsel %vm190_vm1, %v1384_v51, %v2738_v5 }
0x1299   :  { %1392 = vrot.lane.b32.xlu0 %v1390_v0, %s1877_s29 }
0x129b   :  { %v2837_v21 = vpop.permute.xlu1 %184 }
0x129c   :  { %vm189_vm2 = vcmp.eq.s32.totalorder %v2837_v21, 1 }
0x129d   :  { %v1385_v33 = vsel %vm189_vm2, %v1383_v62, %v2733_v12  ;;  %v1387_v41 = vsel %vm189_vm2, %v2814_v22, %v2809_v14  ;;  %v1388_v14 = vsel %vm190_vm1, %v2798_v45, %v2792_v20 }
0x129e   :  { %v1389_v10 = vpack.c.bf16 %v1386_v34, %v1385_v33 }
0x12a0   :  { %1412 = vrot.lane.b32.xlu1 %v1389_v10, %s1877_s29 }
0x130b   :  { %v1393_v35 = vpop.permute.xlu0 %1392 }
0x130c   :  { %1585 = vmatmul.msk.bf16.vlgmr.msrb.gmra.mxu2 %vm207_vm5, %v1393_v35 }
0x1312   :  { %v1413_v29 = vpop.permute.xlu1 %1412 }
0x1313   :  { %1586 = vmatmul.msk.bf16.vlgmr.msrb.gmra.mxu3 %vm207_vm5, %v1413_v29 }
0x138f   :  { %v1406_v28 = vpop.f32.mrf.mxu2 }
0x1396   :  { %v1426_v25 = vpop.f32.mrf.mxu3 }
0x1397   :  { %v1427_v43 = vadd.f32 %v1426_v25, %v1406_v28  ;;  %v1408_v49 = vpop.f32.mrf.mxu2 }
0x1399   :  { %v1431_v32 = vadd.f32 %v2635_v30, %v1427_v43 }
0x139b   :  { %v1433_v12 = vmul.f32 %v1431_v32, %v1956_v8 }
0x139d   :  { %1761 = vtanh.f32 %v1433_v12 }
0x139e   :  { %v1428_v2 = vpop.f32.mrf.mxu3 }
0x139f   :  { %v1429_v5 = vadd.f32 %v1428_v2, %v1408_v49 }
0x13a1   :  { %v1432_v40 = vadd.f32 %v2635_v30, %v1429_v5 }
0x13a3   :  { %v1762_v46 = vpop.eup %1761  ;;  %v1434_v11 = vmul.f32 %v1432_v40, %v1956_v8 }
0x13a4   :  { %v1437_v44 = vmul.f32 %v1762_v46, %v1956_v8 }
0x13a5   :  { %1763 = vtanh.f32 %v1434_v11 }
0x13a6   :  { %v1439_v47 = vadd.f32 %v1437_v44, %v1960_v17 }
0x13a8   :  { %1445 = vrot.lane.b32.xlu2 %v1439_v47, %s1883_s15 }
0x13ab   :  { %v1764_v19 = vpop.eup %1763 }
0x13ac   :  { %v1438_v27 = vmul.f32 %v1764_v19, %v1956_v8  ;;  %v1441_v8 = vmul.f32 %v1439_v47, %v1320_v48 }
0x13ae   :  { %v1440_v57 = vadd.f32 %v1438_v27, %v1960_v17 }
0x13b0   :  { %1447 = vrot.lane.b32.xlu0 %v1440_v57, %s1883_s15  ;;  %v1442_v18 = vmul.f32 %v1440_v57, %v1321_v26 }
0x1402   :  { %v1446_v52 = vpop.permute.xlu2 %1445 }
0x1403   :  { %v1451_v39 = vmul.f32 %v1446_v52, %v1439_v47 }
0x1405   :  { %1455 = vrot.lane.b32.xlu1 %v1451_v39, %s1883_s15 }
0x1422   :  { %v1448_v30 = vpop.permute.xlu0 %1447 }
0x1423   :  { %v1452_v38 = vmul.f32 %v1448_v30, %v1440_v57 }
0x1425   :  { %1457 = vrot.lane.b32.xlu2 %v1452_v38, %s1883_s15 }
0x142d   :  { %1481 = vrot.lane.b32.xlu2 %v1385_v33, %s1877_s29 }
0x1477   :  { %v1456_v58 = vpop.permute.xlu1 %1455 }
0x1478   :  { %v1461_v17 = vadd.f32 %v1456_v58, %v1441_v8 }
0x147a   :  { %1765 = vtanh.f32 %v1461_v17  ;;  %v1477_v24 = vsel %vm189_vm2, %v1461_v17, %v1320_v48 }
0x147f   :  { %v1458_v23 = vpop.permute.xlu2 %1457 }
0x1480   :  { %v1766_v13 = vpop.eup %1765  ;;  %v1462_v54 = vadd.f32 %v1458_v23, %v1442_v18 }
0x1481   :  { %1467 = vrot.lane.b32.xlu0 %v1766_v13, %s1883_s15 }
0x1482   :  { %1767 = vtanh.f32 %v1462_v54  ;;  %v1478_v6 = vsel %vm190_vm1, %v1462_v54, %v1321_v26 }
0x1487   :  { %v1482_v22 = vpop.permute.xlu2 %1481 }
0x1488   :  { %v1768_v1 = vpop.eup %1767 }
0x1489   :  { %1483 = vrot.lane.b32.xlu0 %v1386_v34, %s1877_s29  ;;  %1469 = vrot.lane.b32.xlu1 %v1768_v1, %s1883_s15 }
0x1491   :  { %1497 = vrot.lane.b32.xlu0 %v1387_v41, %s1883_s15 }
0x1499   :  { %1507 = vrot.lane.b32.xlu0 %v1478_v6, %s1877_s29 }
0x14f3   :  { %v1468_v42 = vpop.permute.xlu0 %1467 }
0x14f4   :  { %v1473_v60 = vmul.f32 %v1468_v42, %v1439_v47 }
0x14f6   :  { %v1475_v15 = vsel %vm189_vm2, %v1473_v60, %v2824_v7 }
0x14f7   :  { %1489 = vrot.lane.b32.xlu1 %v1475_v15, %s1884_s5 }
0x14fb   :  { %v1470_v61 = vpop.permute.xlu1 %1469  ;;  %v1484_v9 = vpop.permute.xlu0 %1483 }
0x14fc   :  { %v1474_v50 = vmul.f32 %v1470_v61, %v1440_v57 }
0x14fe   :  { %v1476_v56 = vsel %vm190_vm1, %v1474_v50, %v2829_v3 }
0x14ff   :  { %1499 = vrot.lane.b32.xlu1 %v1388_v14, %s1883_s15  ;;  %1491 = vrot.lane.b32.xlu2 %v1476_v56, %s1884_s5 }
0x1503   :  { %v1498_v37 = vpop.permute.xlu0 %1497 }
0x1507   :  { %1505 = vrot.lane.b32.xlu2 %v1477_v24, %s1877_s29  ;;  %s1527_s29 = sshll.u32 %s2911_s6, 4  ;;  %s1528_s29 = int_to_ptr.hbm [resolvable:$true] %s1527_s29 }
0x150b   :  { %v1508_v59 = vpop.permute.xlu0 %1507 }
0x1559   :  { %v1492_v53 = vpop.permute.xlu2 %1491 }
0x155a   :  { %v1512_v16 = vsel %vm207_vm5, %v1484_v9, %v1492_v53 }
0x1561   :  { %v1506_v45 = vpop.permute.xlu2 %1505 }
0x1569   :  { %v1490_v55 = vpop.permute.xlu1 %1489 }
0x156a   :  { %v1511_v20 = vsel %vm207_vm5, %v1482_v22, %v1490_v55 }
0x156b   :  { %v1514_v31 = vsel %vm1513_vm3, %v1511_v20, %v1498_v37 }
0x156c   :  { %v1517_v63 = vsel %vm1516_vm4, %v1514_v31, %v1506_v45 }
0x156d   :  { %1519 = vst [vmem:[#allocation8] sm:$0xff] %v1517_v63 }
0x1571   :  { %v1500_v4 = vpop.permute.xlu1 %1499 }
0x1572   :  { %v1515_v7 = vsel %vm1513_vm3, %v1512_v16, %v1500_v4 }
0x1573   :  { %v1518_v3 = vsel %vm1516_vm4, %v1515_v7, %v1508_v59 }
0x1574   :  { %1520 = vst [vmem:[#allocation8 + $0x8] sm:$0xff] %v1518_v3 }
0x1575   :  { %1533 = dma.vmem_to_hbm [thread:$0]  %s1526_s8, 256, %s1528_s29, [#allocation4], %s1886_s3, %s1886_s3, %s1887_s11  }
0x1576   :  { %1874 = dma.done.wait [#allocation4], 256  }
0x1577   :  { %1875 = vsyncadd [#allocation4], 4294967040 }
0x1578   :  { %1538 = vsyncpa [#allocation3], 1 }
0x1579   :  { %1539 = vsyncpa [#allocation6], 1 }
0x157a   :  { %1540 = vsyncpa [#allocation4], 1 }

</bundles_post_ra>
